<compile_context>
chip_gen: v7x
topology: tpu7x:2x2x1
jax: 0.10.0
libtpu: 0.0.40
codegen_flags: <defaults>
</compile_context>

<pallas_src>
import math
import numpy as np
import jax
import jax.numpy as jnp
from jax import lax
from jax.experimental import pallas as pl
from jax.experimental.pallas import tpu as pltpu

ALPHA1 = 0.070565992
ALPHA2 = 1.5976
BN_EPS = 1e-5
INV_SQRT2 = 1.0 / math.sqrt(2.0)
# Safe on every generation (v7x has only 64 MiB physical VMEM).  On v5e/v6e (128 MiB)
# this could be raised to 64-96 MiB, but after basis densification no block needs it.
VMEM_LIMIT = 32 * 1024 * 1024


def _round_up(n, m):
    return ((n + m - 1) // m) * m


def _pick_row_tile(r8, cap=512):
    # multiple of 8, <= cap, and (when possible) at least 2 grid steps for pipelining /
    # v7x megacore sharding.
    if r8 <= 8:
        return 8
    half = _round_up((r8 + 1) // 2, 8)
    return min(cap, half)


def _pick_col_tile(wp, cap=512):
    # wp is a multiple of 128; pick the largest multiple of 128 <= cap that divides wp.
    for t in range(min(wp, cap), 0, -128):
        if wp % t == 0:
            return t
    return 128


# ----------------------------- Pallas kernels ------------------------------

def _stft_matmul_kernel(x_ref, b_ref, o_ref):
    # One lane-dense matmul tile: rows x L_pad  @  dense DFT basis tile (L_pad, col_tile).
    o_ref[...] = jnp.dot(x_ref[...], b_ref[...], preferred_element_type=jnp.float32)


def _make_embed_stats_kernel(n_valid, row_tile):
    """Pass 1 of the frequency predictor: embed Linear + masked column sum / sum-sq."""
    def kernel(x_ref, we_ref, be_ref, h_ref, sum_ref, sq_ref):
        i = pl.program_id(0)
        h = jnp.dot(x_ref[...], we_ref[...], preferred_element_type=jnp.float32) + be_ref[...]
        h_ref[...] = h
        # Mask padded rows so BatchNorm batch statistics only see the n_valid real rows.
        row = i * row_tile + lax.broadcasted_iota(jnp.int32, h.shape, 0)
        hm = jnp.where(row < n_valid, h, 0.0)

        @pl.when(i == 0)
        def _():
            sum_ref[...] = jnp.zeros_like(sum_ref)
            sq_ref[...] = jnp.zeros_like(sq_ref)

        sum_ref[...] += jnp.sum(hm, axis=0, keepdims=True)
        sq_ref[...] += jnp.sum(hm * hm, axis=0, keepdims=True)
    return kernel


def _bn_mlp_kernel(h_ref, mu_ref, inv_ref, g_ref, bt_ref,
                   w1_ref, b1_ref, w2_ref, b2_ref, wf_ref, bf_ref, o_ref):
    """Pass 2: BN apply -> Linear -> GELU -> Linear -> residual -> final Linear."""
    h = (h_ref[...] - mu_ref[...]) * inv_ref[...] * g_ref[...] + bt_ref[...]
    m = jnp.dot(h.astype(jnp.bfloat16), w1_ref[...], preferred_element_type=jnp.float32) + b1_ref[...]
    m = 0.5 * m * (1.0 + lax.erf(m * INV_SQRT2))            # exact-erf GELU (PyTorch default)
    m = jnp.dot(m.astype(jnp.bfloat16), w2_ref[...], preferred_element_type=jnp.float32) + b2_ref[...]
    hidden = h + m                                           # dropout p=0.0 -> identity
    o_ref[...] = jnp.dot(hidden.astype(jnp.bfloat16), wf_ref[...],
                         preferred_element_type=jnp.float32) + bf_ref[...]


def _make_gauss_kernel(n_components, clip=False):
    def kernel(x_ref, rm_ref, ris_ref, gm_ref, giv_ref, o_ref):
        # Fused: row normalisation (x - row_mean) * row_inv_std, then page-gauss CDF per
        # mixture component (and optional clamp).  gm/giv are (C,) scalars in SMEM; output
        # is (C, rows, seg_pad) so every store is a full 128-lane vst.
        xn = (x_ref[...] - rm_ref[...]) * ris_ref[...]
        for c in range(n_components):
            t = (xn - gm_ref[c]) * giv_ref[c]
            z = ALPHA1 * t * t * t + ALPHA2 * t
            z = jnp.clip(z, -60.0, 60.0)                     # avoid exp overflow -> inf
            # 1 - 1/(1+exp(z)) == sigmoid(z); exp + approx reciprocal ride the EUP slot
            # (approx recip has ~2^-12 relative error -- negligible for these labels).
            v = pl.reciprocal(1.0 + jnp.exp(-z), approx=True)
            if clip:
                v = jnp.clip(v, -10.0, 10.0)
            o_ref[c] = v
    return kernel


# --------------------- frequency-predictor two-pass driver -------------------

def freq_predictor_forward(x2d, We, be, gamma, beta, W1_bf, b1, W2_bf, b2,
                           Wf_bf, bf_pad, out_cols):
    N, K = x2d.shape
    D = We.shape[1]
    Op = Wf_bf.shape[1]
    r8 = _round_up(N, 8)
    row_tile = _pick_row_tile(r8)
    Rp = _round_up(r8, row_tile)
    n_tiles = Rp // row_tile
    xp = jnp.pad(x2d.astype(jnp.float32), ((0, Rp - N), (0, 0)))

    # ---- pass 1: embed + per-column sum / sum-of-squares (reduction over row tiles) ----
    # TODO(synk): the BN-stats accumulator output keeps this axis "arbitrary"; the heavy
    #             math all lives in the "parallel" pass 2.
    h, col_sum, col_sq = pl.pallas_call(
        _make_embed_stats_kernel(N, row_tile),
        out_shape=(jax.ShapeDtypeStruct((Rp, D), jnp.float32),
                   jax.ShapeDtypeStruct((1, D), jnp.float32),
                   jax.ShapeDtypeStruct((1, D), jnp.float32)),
        grid=(n_tiles,),
        in_specs=[pl.BlockSpec((row_tile, K), lambda i: (i, 0)),
                  pl.BlockSpec((K, D), lambda i: (0, 0)),
                  pl.BlockSpec((1, D), lambda i: (0, 0))],
        out_specs=(pl.BlockSpec((row_tile, D), lambda i: (i, 0)),
                   pl.BlockSpec((1, D), lambda i: (0, 0)),
                   pl.BlockSpec((1, D), lambda i: (0, 0))),
        compiler_params=pltpu.CompilerParams(dimension_semantics=("arbitrary",),
                                             vmem_limit_bytes=VMEM_LIMIT),
    )(xp, We, be)

    # Tiny (1, D) BN statistics in XLA (fused under jit).
    mean = col_sum / N
    var = col_sq / N - mean * mean                           # biased variance (BN training)
    inv_std = lax.rsqrt(var + BN_EPS)

    # ---- pass 2: BN apply + MLP1 (GELU) + residual + final linear, row-parallel ----
    out = pl.pallas_call(
        _bn_mlp_kernel,
        out_shape=jax.ShapeDtypeStruct((Rp, Op), jnp.float32),
        grid=(n_tiles,),
        in_specs=[pl.BlockSpec((row_tile, D), lambda i: (i, 0)),
                  pl.BlockSpec((1, D), lambda i: (0, 0)),
                  pl.BlockSpec((1, D), lambda i: (0, 0)),
                  pl.BlockSpec((1, D), lambda i: (0, 0)),
                  pl.BlockSpec((1, D), lambda i: (0, 0)),
                  pl.BlockSpec((D, D), lambda i: (0, 0)),
                  pl.BlockSpec((1, D), lambda i: (0, 0)),
                  pl.BlockSpec((D, D), lambda i: (0, 0)),
                  pl.BlockSpec((1, D), lambda i: (0, 0)),
                  pl.BlockSpec((D, Op), lambda i: (0, 0)),
                  pl.BlockSpec((1, Op), lambda i: (0, 0))],
        out_specs=pl.BlockSpec((row_tile, Op), lambda i: (i, 0)),
        compiler_params=pltpu.CompilerParams(dimension_semantics=("parallel",),
                                             vmem_limit_bytes=VMEM_LIMIT),
    )(h, mean, inv_std, gamma, beta, W1_bf, b1, W2_bf, b2, Wf_bf, bf_pad)
    return out[:N, :out_cols]


# ------------------------- STFT filter (reconstructed) ----------------------

class STFTFilter:
    """Mirrors Base_Model.stft_transform / smooth_stft_transform (torch.stft, window=None)."""

    def __init__(self, win_size, hop_len, keepratio, in_len, out_len):
        self.win = win_size
        self.hop = hop_len
        self.keepratio = keepratio
        self.in_len = in_len
        self.out_len = out_len
        self.keep = int(keepratio * win_size // 2)
        self._n_bins = win_size // 2 + 1
        n = np.arange(win_size, dtype=np.float32)[:, None]
        k = np.arange(self._n_bins, dtype=np.float32)[None, :]
        ang = 2.0 * np.pi * n * k / win_size
        # DFT as a matmul: [cos | -sin] basis, (win, 2*n_bins)
        self._basis_np = np.concatenate([np.cos(ang), -np.sin(ang)], axis=1).astype(np.float32)
        self._combined_cache = {}

    def generate_period_in_out_len(self, in_len, out_len):
        in_seg = (in_len + 2 * (self.win // 2) - self.win) // self.hop + 1
        left_pad = self.win - self.hop + (self.in_len + self.win // 2 - self.win) % self.hop
        out_seg = (left_pad + out_len + self.win // 2 - self.win) // self.hop + 1
        return in_seg, out_seg

    def _combined_basis(self, L, Lp, Wp, n_frames):
        # Frame extraction folded into a DENSE zero-padded DFT basis:
        #   out[:, f*2nb + k] = sum_n x[f*hop + n] * basis[n, k]
        # Frames are packed contiguously (2*n_bins columns each, padded once to 128 at the
        # end) instead of one 128-lane block per frame, so the basis, the MXU N dim and the
        # output writeback shrink ~12.8x vs. the previous layout.  Kept f32 for fidelity.
        key = (L, Lp, Wp, n_frames)
        if key not in self._combined_cache:
            nb2 = 2 * self._n_bins
            B = np.zeros((Lp, Wp), dtype=np.float32)
            for f in range(n_frames):
                B[f * self.hop: f * self.hop + self.win, f * nb2:(f + 1) * nb2] = self._basis_np
            self._combined_cache[key] = jnp.asarray(B)
        return self._combined_cache[key]

    def _stft(self, x2d, center):
        if center:
            x2d = jnp.pad(x2d, ((0, 0), (self.win // 2, self.win // 2)), mode='reflect')
        R, L = x2d.shape
        n_frames = (L - self.win) // self.hop + 1
        nb = self._n_bins
        W = n_frames * 2 * nb
        Lp = _round_up(L, 128)
        Wp = _round_up(W, 128)
        r8 = _round_up(R, 8)
        row_tile = _pick_row_tile(r8)
        Rp = _round_up(r8, row_tile)
        col_tile = _pick_col_tile(Wp)
        xp = jnp.pad(x2d.astype(jnp.float32), ((0, Rp - R), (0, Lp - L)))
        basis = self._combined_basis(L, Lp, Wp, n_frames)
        # 2-D "parallel" grid: rows x frame-column tiles.  The basis is only ever resident
        # one (Lp, col_tile) tile at a time, so VMEM stays bounded even for long inputs
        # (important on v7x's 64 MiB VMEM), and both TCs can be used.
        # TODO(synk): mark constant-index blocks Buffered(1) once verified against the MLIR.
        out = pl.pallas_call(
            _stft_matmul_kernel,
            out_shape=jax.ShapeDtypeStruct((Rp, Wp), jnp.float32),
            grid=(Rp // row_tile, Wp // col_tile),
            in_specs=[pl.BlockSpec((row_tile, Lp), lambda i, j: (i, 0)),
                      pl.BlockSpec((Lp, col_tile), lambda i, j: (0, j))],
            out_specs=pl.BlockSpec((row_tile, col_tile), lambda i, j: (i, j)),
            compiler_params=pltpu.CompilerParams(
                dimension_semantics=("parallel", "parallel"),
                vmem_limit_bytes=VMEM_LIMIT),
        )(xp, basis)
        spec = out[:R, :W].reshape(R, n_frames, 2 * nb)       # (R, n_frames, 2*nb)
        real = spec[..., :nb]
        imag = spec[..., nb:]
        st = jnp.stack([real, imag], axis=-1)                 # (R, n_frames, nb, 2)
        return jnp.transpose(st, (0, 2, 1, 3))                # (R, nb, n_frames, 2)

    def transform(self, x):
        b, L, d = x.shape
        x2d = jnp.transpose(x, (0, 2, 1)).reshape(b * d, L)
        st = self._stft(x2d, center=True).reshape(b, d, self._n_bins, -1, 2)
        trend = st[:, :, 0, :, 0]
        period = st[:, :, 1:1 + self.keep, :, :]
        return trend, period

    def smooth_transform(self, history, y):
        b, L, d = history.shape
        left_pad = self.win - self.hop + (self.in_len + self.win // 2 - self.win) % self.hop
        tail = jnp.flip(y[:, -(self.win // 2) - 1:-1, :], axis=1)
        total = jnp.concatenate([history[:, -left_pad:, :], y, tail], axis=1)
        t2d = jnp.transpose(total, (0, 2, 1)).reshape(b * d, -1)
        st = self._stft(t2d, center=False).reshape(b, d, self._n_bins, -1, 2)
        trend = st[:, :, 0, :, 0]
        period = st[:, :, 1:1 + self.keep, :, :]
        return trend, period

    def input_rearrange(self, period):
        b, d, c, s, p = period.shape
        return jnp.transpose(period, (0, 1, 2, 4, 3)).reshape(b * d * c * p, s)

    def output_rearrange(self, pred, x_seq_shape):
        b, d, c, s_in, p = x_seq_shape
        out_s = pred.shape[-1]
        return jnp.transpose(pred.reshape(b, d, c, p, out_s), (0, 1, 2, 4, 3))


# ---------------------------- model wrappers --------------------------------

class FrequencyPredictorPallas:
    """Frequency_predictor: embed(Linear+BN) -> MLP1 -> residual -> linear_final."""

    def __init__(self, filter_obj, in_len, out_len, d_model, key):
        self.filter = filter_obj
        hop = filter_obj.hop
        in_len_pad = in_len + (hop - in_len % hop) % hop
        self.in_seg_num, self.out_seg_num = filter_obj.generate_period_in_out_len(in_len_pad, out_len)
        self.d_model = d_model
        ks = jax.random.split(key, 7)
        s = 0.05
        self.We = jax.random.normal(ks[0], (self.in_seg_num, d_model), jnp.float32) * s
        self.be = jax.random.normal(ks[1], (1, d_model), jnp.float32) * s
        self.gamma = jnp.ones((1, d_model), jnp.float32)      # BatchNorm1d affine defaults
        self.beta = jnp.zeros((1, d_model), jnp.float32)
        self.W1 = jax.random.normal(ks[2], (d_model, d_model), jnp.float32) * s
        self.b1 = jax.random.normal(ks[3], (1, d_model), jnp.float32) * s
        self.W2 = jax.random.normal(ks[4], (d_model, d_model), jnp.float32) * s
        self.b2 = jax.random.normal(ks[5], (1, d_model), jnp.float32) * s
        self.Wf = jax.random.normal(ks[6], (d_model, self.out_seg_num), jnp.float32) * s
        self.bf = jnp.zeros((1, self.out_seg_num), jnp.float32)

        # The embed matmul keeps f32 (K ~ in_seg_num is tiny); the d_model x d_model MLP and
        # final matmuls feed the MXU bf16 operands with f32 accumulation.  Only the OUTPUT
        # dim of the final linear is zero-padded to 128 lanes (unmasked stores); no more
        # 128-padding of the contraction dim or XLA-side pre-cast of x.
        self._Op = _round_up(self.out_seg_num, 128)
        self.W1_bf = self.W1.astype(jnp.bfloat16)
        self.W2_bf = self.W2.astype(jnp.bfloat16)
        self.Wf_bf = jnp.pad(self.Wf, ((0, 0), (0, self._Op - self.out_seg_num))).astype(jnp.bfloat16)
        self.bf_pad = jnp.pad(self.bf, ((0, 0), (0, self._Op - self.out_seg_num)))

    def __call__(self, x_seq):
        x2d = self.filter.input_rearrange(x_seq)              # (N, in_seg_num) f32
        pred = freq_predictor_forward(x2d, self.We, self.be, self.gamma, self.beta,
                                      self.W1_bf, self.b1, self.W2_bf, self.b2,
                                      self.Wf_bf, self.bf_pad, self.out_seg_num)
        return self.filter.output_rearrange(pred, x_seq.shape)


class BaseModelPallas:
    def __init__(self, data_dim, in_len, out_len, use_filter=True, win_size=8,
                 hop_len=3, d_model=128, keepratio=0.75, use_gmm=True,
                 n_components=3, key=None):
        self.data_dim = data_dim
        self.in_len = in_len
        self.out_len = out_len
        self.use_filter = use_filter
        self.hop_len = hop_len
        self.win_size = win_size
        self.keepratio = keepratio
        self.use_gmm = use_gmm
        self.n_components = n_components
        self.gmm_mean = None
        self.gmm_variance = None
        self.alpha1 = ALPHA1
        self.alpha2 = ALPHA2
        self.training = True          # PyTorch modules default to training mode
        self._jit_forward = None
        if self.use_filter:
            self.filter = STFTFilter(win_size, hop_len, keepratio, in_len, out_len)
            self.trend_model = None   # TODO(synk): trend_model is None in the reference __init__ (built externally)
            self.period_model = FrequencyPredictorPallas(self.filter, in_len, out_len, d_model, key)
        else:
            self.series_model = None  # TODO(synk): series_model is None in the reference __init__
            self.filter = None

    def init_gmm_mean(self, v):
        self.gmm_mean = v

    def init_gmm_variance(self, v):
        self.gmm_variance = v

    # Fused (row-normalisation + page-gauss [+ clip]) Pallas call.
    # x3: (b, d, S); row stats: (b, d, 1).
    def _page_gauss_fused(self, x3, row_mean, row_std, clip=False):
        b, d, S = x3.shape
        gm = self.gmm_mean.reshape(-1).astype(jnp.float32)
        giv = (1.0 / jnp.sqrt(self.gmm_variance.astype(jnp.float32))).reshape(-1)
        C = int(gm.shape[0])
        R = b * d
        Sp = _round_up(S, 128)
        r8 = _round_up(R, 8)
        row_tile = _pick_row_tile(r8)
        Rp = _round_up(r8, row_tile)
        x2 = jnp.pad(x3.reshape(R, S).astype(jnp.float32), ((0, Rp - R), (0, Sp - S)))
        rm = jnp.pad(row_mean.reshape(R, 1).astype(jnp.float32), ((0, Rp - R), (0, 0)))
        ris = jnp.pad((1.0 / row_std).reshape(R, 1).astype(jnp.float32), ((0, Rp - R), (0, 0)))
        out = pl.pallas_call(
            _make_gauss_kernel(C, clip=clip),
            out_shape=jax.ShapeDtypeStruct((C, Rp, Sp), jnp.float32),
            grid=(Rp // row_tile,),
            in_specs=[pl.BlockSpec((row_tile, Sp), lambda i: (i, 0)),
                      pl.BlockSpec((row_tile, 1), lambda i: (i, 0)),
                      pl.BlockSpec((row_tile, 1), lambda i: (i, 0)),
                      pl.BlockSpec(memory_space=pltpu.MemorySpace.SMEM),
                      pl.BlockSpec(memory_space=pltpu.MemorySpace.SMEM)],
            out_specs=pl.BlockSpec((C, row_tile, Sp), lambda i: (0, i, 0)),
            compiler_params=pltpu.CompilerParams(dimension_semantics=("parallel",),
                                                 vmem_limit_bytes=VMEM_LIMIT),
        )(x2, rm, ris, gm, giv)
        out = out[:, :R, :S]                                  # (C, R, S)
        return jnp.transpose(out, (1, 2, 0)).reshape(b, d, S, C)

    def page_gauss_radial_basis(self, x):
        # Plain (un-normalised) variant of the reference method, same fused kernel.
        b, d, S = x.shape
        zeros = jnp.zeros((b, d, 1), jnp.float32)
        ones = jnp.ones((b, d, 1), jnp.float32)
        return self._page_gauss_fused(x, zeros, ones)

    def _trend_period_forward(self, x, y):
        trend_x, period_x = self.filter.transform(x)
        x_mean = jnp.mean(trend_x, axis=-1, keepdims=True)
        x_var = jnp.var(trend_x, axis=-1, ddof=1, keepdims=True)   # torch.var: unbiased
        x_var = jnp.where(x_var <= 1e-5, 1.0, x_var)
        x_std = jnp.sqrt(x_var + 1e-5)

        # trend_model is None in the reference __init__ -- the page-gauss features on
        # trend_x would feed it, so the launch is gated out (no dead kernel / HBM write).
        predict_trend = None
        if self.trend_model is not None:
            if self.use_gmm:
                trend_x_feat = self._page_gauss_fused(trend_x, x_mean, x_std)
            else:
                trend_x_feat = (trend_x - x_mean) / x_std
            predict_trend = self.trend_model(trend_x_feat)

        predict_periodicity = self.period_model(period_x)

        if self.training:
            trend_y, period_y = self.filter.smooth_transform(x, y)
            if self.use_gmm:
                # clip(-10, 10) fused into the gauss kernel (saves a (C,R,S) HBM round trip)
                trend_y = self._page_gauss_fused(trend_y, x_mean, x_std, clip=True)
            else:
                trend_y = jnp.clip((trend_y - x_mean) / x_std, -10.0, 10.0)
            return (predict_trend, predict_periodicity), (trend_y, period_y)
        # TODO(synk): eval branch (gmm_inference + istft inverse_transform) requires trend_model; not implemented
        raise NotImplementedError

    def forward(self, x, y):
        if self.use_filter:
            if self._jit_forward is None:
                # jit fuses all the pad/slice/transpose glue between the pallas_calls and
                # removes per-op dispatch overhead (gmm params must be set before first call).
                self._jit_forward = jax.jit(self._trend_period_forward)
            return self._jit_forward(x, y)
        # TODO(synk): series_forward path requires series_model which is None in the reference __init__
        raise NotImplementedError


# --------------------------------- demo --------------------------------------

if __name__ == "__main__":
    key = jax.random.PRNGKey(0)
    kx, ky, kp = jax.random.split(key, 3)

    batch, data_dim, in_len, out_len = 2, 4, 24, 12
    x = jax.random.normal(kx, (batch, in_len, data_dim), jnp.float32)
    y = jax.random.normal(ky, (batch, out_len, data_dim), jnp.float32)

    model = BaseModelPallas(data_dim=data_dim, in_len=in_len, out_len=out_len,
                            use_filter=True, win_size=8, hop_len=3, d_model=128,
                            keepratio=0.75, use_gmm=True, n_components=3, key=kp)
    model.init_gmm_mean(jnp.array([-1.0, 0.0, 1.0], jnp.float32))
    model.init_gmm_variance(jnp.array([0.5, 1.0, 1.5], jnp.float32))

    (predict_trend, predict_period), (trend_y, period_y) = model.forward(x, y)
    jax.block_until_ready((predict_period, trend_y, period_y))

    # shape sanity: predict_period matches period_y (b, d, keep, out_seg, 2)
    assert predict_period.shape == period_y.shape
    assert trend_y.shape == (batch, data_dim, period_y.shape[3], model.n_components)

    print("KERNEL_OK")
</pallas_src>

<mosaic_0001>
module attributes {stable_mosaic.version = 11 : i64} {
  func.func @_stft_matmul_kernel(%arg0: i32, %arg1: i32, %arg2: memref<8x128xf32, #tpu.memory_space<vmem>>, %arg3: memref<128x128xf32, #tpu.memory_space<vmem>>, %arg4: memref<8x128xf32, #tpu.memory_space<vmem>>) attributes {dimension_semantics = [#tpu.dimension_semantics<parallel>, #tpu.dimension_semantics<parallel>], iteration_bounds = array<i64: 1, 1>, scalar_prefetch = 0 : i64, scratch_operands = 0 : i64, tpu.core_type = #tpu.core_type<tc>, window_params = [{transform_indices = @transform_0, window_bounds = array<i64: 8, 128>}, {transform_indices = @transform_1, window_bounds = array<i64: 128, 128>}, {transform_indices = @transform_2, window_bounds = array<i64: 8, 128>}]} {
    %c0 = arith.constant 0 : index
    %c0_0 = arith.constant 0 : index
    %0 = vector.load %arg2[%c0, %c0_0] : memref<8x128xf32, #tpu.memory_space<vmem>>, vector<8x128xf32>
    %c0_1 = arith.constant 0 : index
    %c0_2 = arith.constant 0 : index
    %1 = vector.load %arg3[%c0_1, %c0_2] : memref<128x128xf32, #tpu.memory_space<vmem>>, vector<128x128xf32>
    %cst = arith.constant dense<0.000000e+00> : vector<8x128xf32>
    %2 = tpu.matmul %0, %1, %cst {dimension_numbers = #tpu.dot_dimension_numbers<[1], [0], [0], [1], [0, 0, 1, 1], [], []>} : vector<8x128xf32>, vector<128x128xf32>, vector<8x128xf32> -> vector<8x128xf32>
    %c0_3 = arith.constant 0 : index
    %c0_4 = arith.constant 0 : index
    %3 = vector.load %arg4[%c0_3, %c0_4] : memref<8x128xf32, #tpu.memory_space<vmem>>, vector<8x128xf32>
    tpu.vector_store %arg4[%c0_3, %c0_4], %2 {strides = array<i32>} : memref<8x128xf32, #tpu.memory_space<vmem>>, vector<8x128xf32>,
    return
  }
  func.func @transform_0(%arg0: i32, %arg1: i32) -> (i32, i32) {
    %c0_i32 = arith.constant 0 : i32
    %c0_i32_0 = arith.constant 0 : i32
    return %arg0, %c0_i32 : i32, i32
  }
  func.func @transform_1(%arg0: i32, %arg1: i32) -> (i32, i32) {
    %c0_i32 = arith.constant 0 : i32
    %c0_i32_0 = arith.constant 0 : i32
    return %c0_i32, %arg1 : i32, i32
  }
  func.func @transform_2(%arg0: i32, %arg1: i32) -> (i32, i32) {
    %c0_i32 = arith.constant 0 : i32
    return %arg0, %arg1 : i32, i32
  }
}

module attributes {stable_mosaic.version = 11 : i64} {
  func.func @kernel(%arg0: i32, %arg1: memref<24x9xf32, #tpu.memory_space<vmem>>, %arg2: memref<9x128xf32, #tpu.memory_space<vmem>>, %arg3: memref<1x128xf32, #tpu.memory_space<vmem>>, %arg4: memref<24x128xf32, #tpu.memory_space<vmem>>, %arg5: memref<1x128xf32, #tpu.memory_space<vmem>>, %arg6: memref<1x128xf32, #tpu.memory_space<vmem>>) attributes {dimension_semantics = [#tpu.dimension_semantics<arbitrary>], iteration_bounds = array<i64: 2>, scalar_prefetch = 0 : i64, scratch_operands = 0 : i64, tpu.core_type = #tpu.core_type<tc>, window_params = [{transform_indices = @transform_0, window_bounds = array<i64: 24, 9>}, {pipeline_mode = #tpu.pipeline_mode<synchronous>, transform_indices = @transform_1, window_bounds = array<i64: 9, 128>}, {pipeline_mode = #tpu.pipeline_mode<synchronous>, transform_indices = @transform_2, window_bounds = array<i64: 1, 128>}, {transform_indices = @transform_3, window_bounds = array<i64: 24, 128>}, {pipeline_mode = #tpu.pipeline_mode<synchronous>, transform_indices = @transform_4, window_bounds = array<i64: 1, 128>}, {pipeline_mode = #tpu.pipeline_mode<synchronous>, transform_indices = @transform_5, window_bounds = array<i64: 1, 128>}]} {
    %c0 = arith.constant 0 : index
    %c0_0 = arith.constant 0 : index
    %0 = vector.load %arg1[%c0, %c0_0] : memref<24x9xf32, #tpu.memory_space<vmem>>, vector<24x9xf32>
    %c0_1 = arith.constant 0 : index
    %c0_2 = arith.constant 0 : index
    %1 = vector.load %arg2[%c0_1, %c0_2] : memref<9x128xf32, #tpu.memory_space<vmem>>, vector<9x128xf32>
    %cst = arith.constant dense<0.000000e+00> : vector<24x128xf32>
    %2 = tpu.matmul %0, %1, %cst {dimension_numbers = #tpu.dot_dimension_numbers<[1], [0], [0], [1], [0, 0, 1, 1], [], []>} : vector<24x9xf32>, vector<9x128xf32>, vector<24x128xf32> -> vector<24x128xf32>
    %c0_3 = arith.constant 0 : index
    %c0_4 = arith.constant 0 : index
    %3 = vector.load %arg3[%c0_3, %c0_4] : memref<1x128xf32, #tpu.memory_space<vmem>>, vector<1x128xf32>
    %4 = vector.broadcast %3 : vector<1x128xf32> to vector<24x128xf32>
    %5 = arith.addf %2, %4 : vector<24x128xf32>
    %c0_5 = arith.constant 0 : index
    %c0_6 = arith.constant 0 : index
    %6 = vector.load %arg4[%c0_5, %c0_6] : memref<24x128xf32, #tpu.memory_space<vmem>>, vector<24x128xf32>
    tpu.vector_store %arg4[%c0_5, %c0_6], %5 {strides = array<i32>} : memref<24x128xf32, #tpu.memory_space<vmem>>, vector<24x128xf32>,
    %c24_i32 = arith.constant 24 : i32
    %7 = arith.muli %arg0, %c24_i32 : i32
    %8 = tpu.iota {dimensions = array<i32: 0>} : vector<24x128xi32>
    %9 = vector.broadcast %7 : i32 to vector<24x128xi32>
    %10 = arith.addi %9, %8 : vector<24x128xi32>
    %c48_i32 = arith.constant 48 : i32
    %11 = vector.broadcast %c48_i32 : i32 to vector<24x128xi32>
    %12 = arith.cmpi slt, %10, %11 : vector<24x128xi32>
    %cst_7 = arith.constant 0.000000e+00 : f32
    %13 = vector.broadcast %cst_7 : f32 to vector<24x128xf32>
    %14 = arith.select %12, %5, %13 : vector<24x128xi1>, vector<24x128xf32>
    %c0_i32 = arith.constant 0 : i32
    %15 = arith.cmpi eq, %arg0, %c0_i32 : i32
    %16 = arith.extui %15 : i1 to i32
    %c0_i32_8 = arith.constant 0 : i32
    %17 = arith.cmpi ne, %16, %c0_i32_8 : i32
    scf.if %17 {
      %cst_19 = arith.constant 0.000000e+00 : f32
      %29 = vector.broadcast %cst_19 : f32 to vector<1x128xf32>
      %c0_20 = arith.constant 0 : index
      %c0_21 = arith.constant 0 : index
      %30 = vector.load %arg5[%c0_20, %c0_21] : memref<1x128xf32, #tpu.memory_space<vmem>>, vector<1x128xf32>
      tpu.vector_store %arg5[%c0_20, %c0_21], %29 {strides = array<i32>} : memref<1x128xf32, #tpu.memory_space<vmem>>, vector<1x128xf32>,
      %cst_22 = arith.constant 0.000000e+00 : f32
      %31 = vector.broadcast %cst_22 : f32 to vector<1x128xf32>
      %c0_23 = arith.constant 0 : index
      %c0_24 = arith.constant 0 : index
      %32 = vector.load %arg6[%c0_23, %c0_24] : memref<1x128xf32, #tpu.memory_space<vmem>>, vector<1x128xf32>
      tpu.vector_store %arg6[%c0_23, %c0_24], %31 {strides = array<i32>} : memref<1x128xf32, #tpu.memory_space<vmem>>, vector<1x128xf32>,
    } else {
    }
    %c0_9 = arith.constant 0 : index
    %c0_10 = arith.constant 0 : index
    %18 = vector.load %arg5[%c0_9, %c0_10] : memref<1x128xf32, #tpu.memory_space<vmem>>, vector<1x128xf32>
    %cst_11 = arith.constant dense<0.000000e+00> : vector<128xf32>
    %19 = vector.multi_reduction <add>, %14, %cst_11 [0] : vector<24x128xf32> to vector<128xf32>
    %20 = vector.shape_cast %19 : vector<128xf32> to vector<1x128xf32>
    %21 = arith.addf %18, %20 : vector<1x128xf32>
    %c0_12 = arith.constant 0 : index
    %c0_13 = arith.constant 0 : index
    %22 = vector.load %arg5[%c0_12, %c0_13] : memref<1x128xf32, #tpu.memory_space<vmem>>, vector<1x128xf32>
    tpu.vector_store %arg5[%c0_12, %c0_13], %21 {strides = array<i32>} : memref<1x128xf32, #tpu.memory_space<vmem>>, vector<1x128xf32>,
    %c0_14 = arith.constant 0 : index
    %c0_15 = arith.constant 0 : index
    %23 = vector.load %arg6[%c0_14, %c0_15] : memref<1x128xf32, #tpu.memory_space<vmem>>, vector<1x128xf32>
    %24 = arith.mulf %14, %14 : vector<24x128xf32>
    %cst_16 = arith.constant dense<0.000000e+00> : vector<128xf32>
    %25 = vector.multi_reduction <add>, %24, %cst_16 [0] : vector<24x128xf32> to vector<128xf32>
    %26 = vector.shape_cast %25 : vector<128xf32> to vector<1x128xf32>
    %27 = arith.addf %23, %26 : vector<1x128xf32>
    %c0_17 = arith.constant 0 : index
    %c0_18 = arith.constant 0 : index
    %28 = vector.load %arg6[%c0_17, %c0_18] : memref<1x128xf32, #tpu.memory_space<vmem>>, vector<1x128xf32>
    tpu.vector_store %arg6[%c0_17, %c0_18], %27 {strides = array<i32>} : memref<1x128xf32, #tpu.memory_space<vmem>>, vector<1x128xf32>,
    return
  }
  func.func @transform_0(%arg0: i32) -> (i32, i32) {
    %c0_i32 = arith.constant 0 : i32
    %c0_i32_0 = arith.constant 0 : i32
    return %arg0, %c0_i32 : i32, i32
  }
  func.func @transform_1(%arg0: i32) -> (i32, i32) {
    %c0_i32 = arith.constant 0 : i32
    %c0_i32_0 = arith.constant 0 : i32
    %c0_i32_1 = arith.constant 0 : i32
    return %c0_i32, %c0_i32_0 : i32, i32
  }
  func.func @transform_2(%arg0: i32) -> (i32, i32) {
    %c0_i32 = arith.constant 0 : i32
    %c0_i32_0 = arith.constant 0 : i32
    %c0_i32_1 = arith.constant 0 : i32
    return %c0_i32, %c0_i32_0 : i32, i32
  }
  func.func @transform_3(%arg0: i32) -> (i32, i32) {
    %c0_i32 = arith.constant 0 : i32
    %c0_i32_0 = arith.constant 0 : i32
    return %arg0, %c0_i32 : i32, i32
  }
  func.func @transform_4(%arg0: i32) -> (i32, i32) {
    %c0_i32 = arith.constant 0 : i32
    %c0_i32_0 = arith.constant 0 : i32
    %c0_i32_1 = arith.constant 0 : i32
    return %c0_i32, %c0_i32_0 : i32, i32
  }
  func.func @transform_5(%arg0: i32) -> (i32, i32) {
    %c0_i32 = arith.constant 0 : i32
    %c0_i32_0 = arith.constant 0 : i32
    %c0_i32_1 = arith.constant 0 : i32
    return %c0_i32, %c0_i32_0 : i32, i32
  }
}

module attributes {stable_mosaic.version = 11 : i64} {
  func.func @_bn_mlp_kernel(%arg0: i32, %arg1: memref<24x128xf32, #tpu.memory_space<vmem>>, %arg2: memref<1x128xf32, #tpu.memory_space<vmem>>, %arg3: memref<1x128xf32, #tpu.memory_space<vmem>>, %arg4: memref<1x128xf32, #tpu.memory_space<vmem>>, %arg5: memref<1x128xf32, #tpu.memory_space<vmem>>, %arg6: memref<128x128xbf16, #tpu.memory_space<vmem>>, %arg7: memref<1x128xf32, #tpu.memory_space<vmem>>, %arg8: memref<128x128xbf16, #tpu.memory_space<vmem>>, %arg9: memref<1x128xf32, #tpu.memory_space<vmem>>, %arg10: memref<128x128xbf16, #tpu.memory_space<vmem>>, %arg11: memref<1x128xf32, #tpu.memory_space<vmem>>, %arg12: memref<24x128xf32, #tpu.memory_space<vmem>>) attributes {dimension_semantics = [#tpu.dimension_semantics<parallel>], iteration_bounds = array<i64: 2>, scalar_prefetch = 0 : i64, scratch_operands = 0 : i64, tpu.core_type = #tpu.core_type<tc>, window_params = [{transform_indices = @transform_0, window_bounds = array<i64: 24, 128>}, {pipeline_mode = #tpu.pipeline_mode<synchronous>, transform_indices = @transform_1, window_bounds = array<i64: 1, 128>}, {pipeline_mode = #tpu.pipeline_mode<synchronous>, transform_indices = @transform_2, window_bounds = array<i64: 1, 128>}, {pipeline_mode = #tpu.pipeline_mode<synchronous>, transform_indices = @transform_3, window_bounds = array<i64: 1, 128>}, {pipeline_mode = #tpu.pipeline_mode<synchronous>, transform_indices = @transform_4, window_bounds = array<i64: 1, 128>}, {pipeline_mode = #tpu.pipeline_mode<synchronous>, transform_indices = @transform_5, window_bounds = array<i64: 128, 128>}, {pipeline_mode = #tpu.pipeline_mode<synchronous>, transform_indices = @transform_6, window_bounds = array<i64: 1, 128>}, {pipeline_mode = #tpu.pipeline_mode<synchronous>, transform_indices = @transform_7, window_bounds = array<i64: 128, 128>}, {pipeline_mode = #tpu.pipeline_mode<synchronous>, transform_indices = @transform_8, window_bounds = array<i64: 1, 128>}, {pipeline_mode = #tpu.pipeline_mode<synchronous>, transform_indices = @transform_9, window_bounds = array<i64: 128, 128>}, {pipeline_mode = #tpu.pipeline_mode<synchronous>, transform_indices = @transform_10, window_bounds = array<i64: 1, 128>}, {transform_indices = @transform_11, window_bounds = array<i64: 24, 128>}]} {
    %c0 = arith.constant 0 : index
    %c0_0 = arith.constant 0 : index
    %0 = vector.load %arg1[%c0, %c0_0] : memref<24x128xf32, #tpu.memory_space<vmem>>, vector<24x128xf32>
    %c0_1 = arith.constant 0 : index
    %c0_2 = arith.constant 0 : index
    %1 = vector.load %arg2[%c0_1, %c0_2] : memref<1x128xf32, #tpu.memory_space<vmem>>, vector<1x128xf32>
    %2 = vector.broadcast %1 : vector<1x128xf32> to vector<24x128xf32>
    %3 = arith.subf %0, %2 : vector<24x128xf32>
    %c0_3 = arith.constant 0 : index
    %c0_4 = arith.constant 0 : index
    %4 = vector.load %arg3[%c0_3, %c0_4] : memref<1x128xf32, #tpu.memory_space<vmem>>, vector<1x128xf32>
    %5 = vector.broadcast %4 : vector<1x128xf32> to vector<24x128xf32>
    %6 = arith.mulf %3, %5 : vector<24x128xf32>
    %c0_5 = arith.constant 0 : index
    %c0_6 = arith.constant 0 : index
    %7 = vector.load %arg4[%c0_5, %c0_6] : memref<1x128xf32, #tpu.memory_space<vmem>>, vector<1x128xf32>
    %8 = vector.broadcast %7 : vector<1x128xf32> to vector<24x128xf32>
    %9 = arith.mulf %6, %8 : vector<24x128xf32>
    %c0_7 = arith.constant 0 : index
    %c0_8 = arith.constant 0 : index
    %10 = vector.load %arg5[%c0_7, %c0_8] : memref<1x128xf32, #tpu.memory_space<vmem>>, vector<1x128xf32>
    %11 = vector.broadcast %10 : vector<1x128xf32> to vector<24x128xf32>
    %12 = arith.addf %9, %11 : vector<24x128xf32>
    %13 = arith.truncf %12 : vector<24x128xf32> to vector<24x128xbf16>
    %c0_9 = arith.constant 0 : index
    %c0_10 = arith.constant 0 : index
    %14 = vector.load %arg6[%c0_9, %c0_10] : memref<128x128xbf16, #tpu.memory_space<vmem>>, vector<128x128xbf16>
    %cst = arith.constant dense<0.000000e+00> : vector<24x128xf32>
    %15 = tpu.matmul %13, %14, %cst {dimension_numbers = #tpu.dot_dimension_numbers<[1], [0], [0], [1], [0, 0, 1, 1], [], []>} : vector<24x128xbf16>, vector<128x128xbf16>, vector<24x128xf32> -> vector<24x128xf32>
    %c0_11 = arith.constant 0 : index
    %c0_12 = arith.constant 0 : index
    %16 = vector.load %arg7[%c0_11, %c0_12] : memref<1x128xf32, #tpu.memory_space<vmem>>, vector<1x128xf32>
    %17 = vector.broadcast %16 : vector<1x128xf32> to vector<24x128xf32>
    %18 = arith.addf %15, %17 : vector<24x128xf32>
    %cst_13 = arith.constant 5.000000e-01 : f32
    %19 = vector.broadcast %cst_13 : f32 to vector<24x128xf32>
    %20 = arith.mulf %19, %18 : vector<24x128xf32>
    %cst_14 = arith.constant 0.707106769 : f32
    %21 = vector.broadcast %cst_14 : f32 to vector<24x128xf32>
    %22 = arith.mulf %18, %21 : vector<24x128xf32>
    %23 = math.erf %22 : vector<24x128xf32>
    %cst_15 = arith.constant 1.000000e+00 : f32
    %24 = vector.broadcast %cst_15 : f32 to vector<24x128xf32>
    %25 = arith.addf %24, %23 : vector<24x128xf32>
    %26 = arith.mulf %20, %25 : vector<24x128xf32>
    %27 = arith.truncf %26 : vector<24x128xf32> to vector<24x128xbf16>
    %c0_16 = arith.constant 0 : index
    %c0_17 = arith.constant 0 : index
    %28 = vector.load %arg8[%c0_16, %c0_17] : memref<128x128xbf16, #tpu.memory_space<vmem>>, vector<128x128xbf16>
    %cst_18 = arith.constant dense<0.000000e+00> : vector<24x128xf32>
    %29 = tpu.matmul %27, %28, %cst_18 {dimension_numbers = #tpu.dot_dimension_numbers<[1], [0], [0], [1], [0, 0, 1, 1], [], []>} : vector<24x128xbf16>, vector<128x128xbf16>, vector<24x128xf32> -> vector<24x128xf32>
    %c0_19 = arith.constant 0 : index
    %c0_20 = arith.constant 0 : index
    %30 = vector.load %arg9[%c0_19, %c0_20] : memref<1x128xf32, #tpu.memory_space<vmem>>, vector<1x128xf32>
    %31 = vector.broadcast %30 : vector<1x128xf32> to vector<24x128xf32>
    %32 = arith.addf %29, %31 : vector<24x128xf32>
    %33 = arith.addf %12, %32 : vector<24x128xf32>
    %34 = arith.truncf %33 : vector<24x128xf32> to vector<24x128xbf16>
    %c0_21 = arith.constant 0 : index
    %c0_22 = arith.constant 0 : index
    %35 = vector.load %arg10[%c0_21, %c0_22] : memref<128x128xbf16, #tpu.memory_space<vmem>>, vector<128x128xbf16>
    %cst_23 = arith.constant dense<0.000000e+00> : vector<24x128xf32>
    %36 = tpu.matmul %34, %35, %cst_23 {dimension_numbers = #tpu.dot_dimension_numbers<[1], [0], [0], [1], [0, 0, 1, 1], [], []>} : vector<24x128xbf16>, vector<128x128xbf16>, vector<24x128xf32> -> vector<24x128xf32>
    %c0_24 = arith.constant 0 : index
    %c0_25 = arith.constant 0 : index
    %37 = vector.load %arg11[%c0_24, %c0_25] : memref<1x128xf32, #tpu.memory_space<vmem>>, vector<1x128xf32>
    %38 = vector.broadcast %37 : vector<1x128xf32> to vector<24x128xf32>
    %39 = arith.addf %36, %38 : vector<24x128xf32>
    %c0_26 = arith.constant 0 : index
    %c0_27 = arith.constant 0 : index
    %40 = vector.load %arg12[%c0_26, %c0_27] : memref<24x128xf32, #tpu.memory_space<vmem>>, vector<24x128xf32>
    tpu.vector_store %arg12[%c0_26, %c0_27], %39 {strides = array<i32>} : memref<24x128xf32, #tpu.memory_space<vmem>>, vector<24x128xf32>,
    return
  }
  func.func @transform_0(%arg0: i32) -> (i32, i32) {
    %c0_i32 = arith.constant 0 : i32
    %c0_i32_0 = arith.constant 0 : i32
    return %arg0, %c0_i32 : i32, i32
  }
  func.func @transform_1(%arg0: i32) -> (i32, i32) {
    %c0_i32 = arith.constant 0 : i32
    %c0_i32_0 = arith.constant 0 : i32
    %c0_i32_1 = arith.constant 0 : i32
    return %c0_i32, %c0_i32_0 : i32, i32
  }
  func.func @transform_2(%arg0: i32) -> (i32, i32) {
    %c0_i32 = arith.constant 0 : i32
    %c0_i32_0 = arith.constant 0 : i32
    %c0_i32_1 = arith.constant 0 : i32
    return %c0_i32, %c0_i32_0 : i32, i32
  }
  func.func @transform_3(%arg0: i32) -> (i32, i32) {
    %c0_i32 = arith.constant 0 : i32
    %c0_i32_0 = arith.constant 0 : i32
    %c0_i32_1 = arith.constant 0 : i32
    return %c0_i32, %c0_i32_0 : i32, i32
  }
  func.func @transform_4(%arg0: i32) -> (i32, i32) {
    %c0_i32 = arith.constant 0 : i32
    %c0_i32_0 = arith.constant 0 : i32
    %c0_i32_1 = arith.constant 0 : i32
    return %c0_i32, %c0_i32_0 : i32, i32
  }
  func.func @transform_5(%arg0: i32) -> (i32, i32) {
    %c0_i32 = arith.constant 0 : i32
    %c0_i32_0 = arith.constant 0 : i32
    %c0_i32_1 = arith.constant 0 : i32
    return %c0_i32, %c0_i32_0 : i32, i32
  }
  func.func @transform_6(%arg0: i32) -> (i32, i32) {
    %c0_i32 = arith.constant 0 : i32
    %c0_i32_0 = arith.constant 0 : i32
    %c0_i32_1 = arith.constant 0 : i32
    return %c0_i32, %c0_i32_0 : i32, i32
  }
  func.func @transform_7(%arg0: i32) -> (i32, i32) {
    %c0_i32 = arith.constant 0 : i32
    %c0_i32_0 = arith.constant 0 : i32
    %c0_i32_1 = arith.constant 0 : i32
    return %c0_i32, %c0_i32_0 : i32, i32
  }
  func.func @transform_8(%arg0: i32) -> (i32, i32) {
    %c0_i32 = arith.constant 0 : i32
    %c0_i32_0 = arith.constant 0 : i32
    %c0_i32_1 = arith.constant 0 : i32
    return %c0_i32, %c0_i32_0 : i32, i32
  }
  func.func @transform_9(%arg0: i32) -> (i32, i32) {
    %c0_i32 = arith.constant 0 : i32
    %c0_i32_0 = arith.constant 0 : i32
    %c0_i32_1 = arith.constant 0 : i32
    return %c0_i32, %c0_i32_0 : i32, i32
  }
  func.func @transform_10(%arg0: i32) -> (i32, i32) {
    %c0_i32 = arith.constant 0 : i32
    %c0_i32_0 = arith.constant 0 : i32
    %c0_i32_1 = arith.constant 0 : i32
    return %c0_i32, %c0_i32_0 : i32, i32
  }
  func.func @transform_11(%arg0: i32) -> (i32, i32) {
    %c0_i32 = arith.constant 0 : i32
    %c0_i32_0 = arith.constant 0 : i32
    return %arg0, %c0_i32 : i32, i32
  }
}

module attributes {stable_mosaic.version = 11 : i64} {
  func.func @kernel(%arg0: i32, %arg1: memref<8x128xf32, #tpu.memory_space<vmem>>, %arg2: memref<8x1xf32, #tpu.memory_space<vmem>>, %arg3: memref<8x1xf32, #tpu.memory_space<vmem>>, %arg4: memref<3xf32, #tpu.memory_space<smem>>, %arg5: memref<3xf32, #tpu.memory_space<smem>>, %arg6: memref<3x8x128xf32, #tpu.memory_space<vmem>>) attributes {dimension_semantics = [#tpu.dimension_semantics<parallel>], iteration_bounds = array<i64: 1>, scalar_prefetch = 0 : i64, scratch_operands = 0 : i64, tpu.core_type = #tpu.core_type<tc>, window_params = [{transform_indices = @transform_0, window_bounds = array<i64: 8, 128>}, {transform_indices = @transform_1, window_bounds = array<i64: 8, 1>}, {transform_indices = @transform_2, window_bounds = array<i64: 8, 1>}, {transform_indices = @transform_3, window_bounds = array<i64: 3>}, {transform_indices = @transform_4, window_bounds = array<i64: 3>}, {transform_indices = @transform_5, window_bounds = array<i64: 3, 8, 128>}]} {
    %c0 = arith.constant 0 : index
    %c0_0 = arith.constant 0 : index
    %0 = vector.load %arg1[%c0, %c0_0] : memref<8x128xf32, #tpu.memory_space<vmem>>, vector<8x128xf32>
    %c0_1 = arith.constant 0 : index
    %c0_2 = arith.constant 0 : index
    %1 = vector.load %arg2[%c0_1, %c0_2] : memref<8x1xf32, #tpu.memory_space<vmem>>, vector<8x1xf32>
    %2 = vector.broadcast %1 : vector<8x1xf32> to vector<8x128xf32>
    %3 = arith.subf %0, %2 : vector<8x128xf32>
    %c0_3 = arith.constant 0 : index
    %c0_4 = arith.constant 0 : index
    %4 = vector.load %arg3[%c0_3, %c0_4] : memref<8x1xf32, #tpu.memory_space<vmem>>, vector<8x1xf32>
    %5 = vector.broadcast %4 : vector<8x1xf32> to vector<8x128xf32>
    %6 = arith.mulf %3, %5 : vector<8x128xf32>
    %c0_5 = arith.constant 0 : index
    %7 = memref.load %arg4[%c0_5] : memref<3xf32, #tpu.memory_space<smem>>
    %8 = vector.broadcast %7 : f32 to vector<8x128xf32>
    %9 = arith.subf %6, %8 : vector<8x128xf32>
    %c0_6 = arith.constant 0 : index
    %10 = memref.load %arg5[%c0_6] : memref<3xf32, #tpu.memory_space<smem>>
    %11 = vector.broadcast %10 : f32 to vector<8x128xf32>
    %12 = arith.mulf %9, %11 : vector<8x128xf32>
    %cst = arith.constant 0.0705659911 : f32
    %13 = vector.broadcast %cst : f32 to vector<8x128xf32>
    %14 = arith.mulf %13, %12 : vector<8x128xf32>
    %15 = arith.mulf %14, %12 : vector<8x128xf32>
    %16 = arith.mulf %15, %12 : vector<8x128xf32>
    %cst_7 = arith.constant 1.597600e+00 : f32
    %17 = vector.broadcast %cst_7 : f32 to vector<8x128xf32>
    %18 = arith.mulf %17, %12 : vector<8x128xf32>
    %19 = arith.addf %16, %18 : vector<8x128xf32>
    %cst_8 = arith.constant -6.000000e+01 : f32
    %cst_9 = arith.constant 6.000000e+01 : f32
    %20 = vector.broadcast %cst_8 : f32 to vector<8x128xf32>
    %21 = arith.maximumf %20, %19 : vector<8x128xf32>
    %22 = vector.broadcast %cst_9 : f32 to vector<8x128xf32>
    %23 = arith.minimumf %22, %21 : vector<8x128xf32>
    %cst_10 = arith.constant 0.000000e+00 : f32
    %24 = vector.broadcast %cst_10 : f32 to vector<8x128xf32>
    %25 = arith.subf %24, %23 : vector<8x128xf32>
    %26 = math.exp %25 : vector<8x128xf32>
    %cst_11 = arith.constant 1.000000e+00 : f32
    %27 = vector.broadcast %cst_11 : f32 to vector<8x128xf32>
    %28 = arith.addf %27, %26 : vector<8x128xf32>
    %29 = tpu.reciprocal %28 {approx = true} : vector<8x128xf32> -> vector<8x128xf32>
    %cst_12 = arith.constant -1.000000e+01 : f32
    %cst_13 = arith.constant 1.000000e+01 : f32
    %30 = vector.broadcast %cst_12 : f32 to vector<8x128xf32>
    %31 = arith.maximumf %30, %29 : vector<8x128xf32>
    %32 = vector.broadcast %cst_13 : f32 to vector<8x128xf32>
    %33 = arith.minimumf %32, %31 : vector<8x128xf32>
    %c0_14 = arith.constant 0 : index
    %c0_15 = arith.constant 0 : index
    %c0_16 = arith.constant 0 : index
    %34 = vector.load %arg6[%c0_14, %c0_15, %c0_16] : memref<3x8x128xf32, #tpu.memory_space<vmem>>, vector<1x8x128xf32>
    %35 = vector.shape_cast %34 : vector<1x8x128xf32> to vector<8x128xf32>
    %36 = vector.shape_cast %33 : vector<8x128xf32> to vector<1x8x128xf32>
    tpu.vector_store %arg6[%c0_14, %c0_15, %c0_16], %36 {strides = array<i32>} : memref<3x8x128xf32, #tpu.memory_space<vmem>>, vector<1x8x128xf32>,
    %c1 = arith.constant 1 : index
    %37 = memref.load %arg4[%c1] : memref<3xf32, #tpu.memory_space<smem>>
    %38 = vector.broadcast %37 : f32 to vector<8x128xf32>
    %39 = arith.subf %6, %38 : vector<8x128xf32>
    %c1_17 = arith.constant 1 : index
    %40 = memref.load %arg5[%c1_17] : memref<3xf32, #tpu.memory_space<smem>>
    %41 = vector.broadcast %40 : f32 to vector<8x128xf32>
    %42 = arith.mulf %39, %41 : vector<8x128xf32>
    %cst_18 = arith.constant 0.0705659911 : f32
    %43 = vector.broadcast %cst_18 : f32 to vector<8x128xf32>
    %44 = arith.mulf %43, %42 : vector<8x128xf32>
    %45 = arith.mulf %44, %42 : vector<8x128xf32>
    %46 = arith.mulf %45, %42 : vector<8x128xf32>
    %cst_19 = arith.constant 1.597600e+00 : f32
    %47 = vector.broadcast %cst_19 : f32 to vector<8x128xf32>
    %48 = arith.mulf %47, %42 : vector<8x128xf32>
    %49 = arith.addf %46, %48 : vector<8x128xf32>
    %cst_20 = arith.constant -6.000000e+01 : f32
    %cst_21 = arith.constant 6.000000e+01 : f32
    %50 = vector.broadcast %cst_20 : f32 to vector<8x128xf32>
    %51 = arith.maximumf %50, %49 : vector<8x128xf32>
    %52 = vector.broadcast %cst_21 : f32 to vector<8x128xf32>
    %53 = arith.minimumf %52, %51 : vector<8x128xf32>
    %cst_22 = arith.constant 0.000000e+00 : f32
    %54 = vector.broadcast %cst_22 : f32 to vector<8x128xf32>
    %55 = arith.subf %54, %53 : vector<8x128xf32>
    %56 = math.exp %55 : vector<8x128xf32>
    %cst_23 = arith.constant 1.000000e+00 : f32
    %57 = vector.broadcast %cst_23 : f32 to vector<8x128xf32>
    %58 = arith.addf %57, %56 : vector<8x128xf32>
    %59 = tpu.reciprocal %58 {approx = true} : vector<8x128xf32> -> vector<8x128xf32>
    %cst_24 = arith.constant -1.000000e+01 : f32
    %cst_25 = arith.constant 1.000000e+01 : f32
    %60 = vector.broadcast %cst_24 : f32 to vector<8x128xf32>
    %61 = arith.maximumf %60, %59 : vector<8x128xf32>
    %62 = vector.broadcast %cst_25 : f32 to vector<8x128xf32>
    %63 = arith.minimumf %62, %61 : vector<8x128xf32>
    %c1_26 = arith.constant 1 : index
    %c0_27 = arith.constant 0 : index
    %c0_28 = arith.constant 0 : index
    %64 = vector.load %arg6[%c1_26, %c0_27, %c0_28] : memref<3x8x128xf32, #tpu.memory_space<vmem>>, vector<1x8x128xf32>
    %65 = vector.shape_cast %64 : vector<1x8x128xf32> to vector<8x128xf32>
    %66 = vector.shape_cast %63 : vector<8x128xf32> to vector<1x8x128xf32>
    tpu.vector_store %arg6[%c1_26, %c0_27, %c0_28], %66 {strides = array<i32>} : memref<3x8x128xf32, #tpu.memory_space<vmem>>, vector<1x8x128xf32>,
    %c2 = arith.constant 2 : index
    %67 = memref.load %arg4[%c2] : memref<3xf32, #tpu.memory_space<smem>>
    %68 = vector.broadcast %67 : f32 to vector<8x128xf32>
    %69 = arith.subf %6, %68 : vector<8x128xf32>
    %c2_29 = arith.constant 2 : index
    %70 = memref.load %arg5[%c2_29] : memref<3xf32, #tpu.memory_space<smem>>
    %71 = vector.broadcast %70 : f32 to vector<8x128xf32>
    %72 = arith.mulf %69, %71 : vector<8x128xf32>
    %cst_30 = arith.constant 0.0705659911 : f32
    %73 = vector.broadcast %cst_30 : f32 to vector<8x128xf32>
    %74 = arith.mulf %73, %72 : vector<8x128xf32>
    %75 = arith.mulf %74, %72 : vector<8x128xf32>
    %76 = arith.mulf %75, %72 : vector<8x128xf32>
    %cst_31 = arith.constant 1.597600e+00 : f32
    %77 = vector.broadcast %cst_31 : f32 to vector<8x128xf32>
    %78 = arith.mulf %77, %72 : vector<8x128xf32>
    %79 = arith.addf %76, %78 : vector<8x128xf32>
    %cst_32 = arith.constant -6.000000e+01 : f32
    %cst_33 = arith.constant 6.000000e+01 : f32
    %80 = vector.broadcast %cst_32 : f32 to vector<8x128xf32>
    %81 = arith.maximumf %80, %79 : vector<8x128xf32>
    %82 = vector.broadcast %cst_33 : f32 to vector<8x128xf32>
    %83 = arith.minimumf %82, %81 : vector<8x128xf32>
    %cst_34 = arith.constant 0.000000e+00 : f32
    %84 = vector.broadcast %cst_34 : f32 to vector<8x128xf32>
    %85 = arith.subf %84, %83 : vector<8x128xf32>
    %86 = math.exp %85 : vector<8x128xf32>
    %cst_35 = arith.constant 1.000000e+00 : f32
    %87 = vector.broadcast %cst_35 : f32 to vector<8x128xf32>
    %88 = arith.addf %87, %86 : vector<8x128xf32>
    %89 = tpu.reciprocal %88 {approx = true} : vector<8x128xf32> -> vector<8x128xf32>
    %cst_36 = arith.constant -1.000000e+01 : f32
    %cst_37 = arith.constant 1.000000e+01 : f32
    %90 = vector.broadcast %cst_36 : f32 to vector<8x128xf32>
    %91 = arith.maximumf %90, %89 : vector<8x128xf32>
    %92 = vector.broadcast %cst_37 : f32 to vector<8x128xf32>
    %93 = arith.minimumf %92, %91 : vector<8x128xf32>
    %c2_38 = arith.constant 2 : index
    %c0_39 = arith.constant 0 : index
    %c0_40 = arith.constant 0 : index
    %94 = vector.load %arg6[%c2_38, %c0_39, %c0_40] : memref<3x8x128xf32, #tpu.memory_space<vmem>>, vector<1x8x128xf32>
    %95 = vector.shape_cast %94 : vector<1x8x128xf32> to vector<8x128xf32>
    %96 = vector.shape_cast %93 : vector<8x128xf32> to vector<1x8x128xf32>
    tpu.vector_store %arg6[%c2_38, %c0_39, %c0_40], %96 {strides = array<i32>} : memref<3x8x128xf32, #tpu.memory_space<vmem>>, vector<1x8x128xf32>,
    return
  }
  func.func @transform_0(%arg0: i32) -> (i32, i32) {
    %c0_i32 = arith.constant 0 : i32
    %c0_i32_0 = arith.constant 0 : i32
    return %arg0, %c0_i32 : i32, i32
  }
  func.func @transform_1(%arg0: i32) -> (i32, i32) {
    %c0_i32 = arith.constant 0 : i32
    %c0_i32_0 = arith.constant 0 : i32
    return %arg0, %c0_i32 : i32, i32
  }
  func.func @transform_2(%arg0: i32) -> (i32, i32) {
    %c0_i32 = arith.constant 0 : i32
    %c0_i32_0 = arith.constant 0 : i32
    return %arg0, %c0_i32 : i32, i32
  }
  func.func @transform_3(%arg0: i32) -> i32 {
    %c0_i32 = arith.constant 0 : i32
    %c0_i32_0 = arith.constant 0 : i32
    return %c0_i32 : i32
  }
  func.func @transform_4(%arg0: i32) -> i32 {
    %c0_i32 = arith.constant 0 : i32
    %c0_i32_0 = arith.constant 0 : i32
    return %c0_i32 : i32
  }
  func.func @transform_5(%arg0: i32) -> (i32, i32, i32) {
    %c0_i32 = arith.constant 0 : i32
    %c0_i32_0 = arith.constant 0 : i32
    %c0_i32_1 = arith.constant 0 : i32
    return %c0_i32, %arg0, %c0_i32_0 : i32, i32, i32
  }
}

</mosaic_0001>

<bundles_post_ra>
// kernel: _trend_period_forward.5
= control target key start
LH: loop header
LB: loop body
LE: loop exit
PB: predicated region body
PF: predicated region fallthrough
CT: control target
= control target key end

     0   :  { %v182_v0 = vmov 0.0|0.0   ;;  %vm183_vm0 = vmmov 0   ;;  %v184_v4 = vmov 0.0   ;;  %s254_s1 = inlined_call_operand.vmem [shape: f32[128,128], index: 1, kind: input, shape index: {}]   ;;  %s255_s0 = inlined_call_operand.vmem [shape: f32[8,128], index: 0, kind: input, shape index: {}]   ;;  %s256_s2 = inlined_call_operand.vmem [shape: f32[8,128], index: 2, kind: output, shape index: {}]  }
   0x1   :  { %155 = vmatprep.subr.bf16.mxu0 %v182_v0  ;;  %v12_v1 = vld [vmem:[%s254_s1] sm:$0xff]  ;;  %v13_v2 = vld [vmem:[%s254_s1 + $0x8] sm:$0xff]  ;;  %v14_v3 = vld [vmem:[%s254_s1 + $0x10] sm:$0xff]  ;;  %152 = vmatprep.mubr.msk.f32.mxu0 %vm183_vm0, %v184_v4 }
   0x2   :  { %v156_v5 = vpack.c.bf16 %v13_v2, %v12_v1  ;;  %v15_v6 = vld [vmem:[%s254_s1 + $0x18] sm:$0xff]  ;;  %v16_v8 = vld [vmem:[%s254_s1 + $0x20] sm:$0xff]  ;;  %v17_v9 = vld [vmem:[%s254_s1 + $0x28] sm:$0xff] }
   0x3   :  { %v159_v7 = vpack.c.bf16 %v15_v6, %v14_v3  ;;  %v162_v10 = vpack.c.bf16 %v17_v9, %v16_v8  ;;  %v18_v11 = vld [vmem:[%s254_s1 + $0x30] sm:$0xff]  ;;  %v19_v12 = vld [vmem:[%s254_s1 + $0x38] sm:$0xff]  ;;  %v20_v14 = vld [vmem:[%s254_s1 + $0x40] sm:$0xff] }
   0x4   :  { %157 = vmatpush3.bf16.msra.mxu0 %v156_v5  ;;  %v165_v13 = vpack.c.bf16 %v19_v12, %v18_v11  ;;  %v21_v15 = vld [vmem:[%s254_s1 + $0x48] sm:$0xff]  ;;  %v22_v17 = vld [vmem:[%s254_s1 + $0x50] sm:$0xff]  ;;  %v23_v18 = vld [vmem:[%s254_s1 + $0x58] sm:$0xff] }
   0x5   :  { %158 = vmatprep.subr.bf16.mxu0 %v182_v0  ;;  %v168_v16 = vpack.c.bf16 %v21_v15, %v20_v14  ;;  %v171_v19 = vpack.c.bf16 %v23_v18, %v22_v17  ;;  %v24_v20 = vld [vmem:[%s254_s1 + $0x60] sm:$0xff]  ;;  %v25_v21 = vld [vmem:[%s254_s1 + $0x68] sm:$0xff]  ;;  %v26_v23 = vld [vmem:[%s254_s1 + $0x70] sm:$0xff] }
   0x6   :  { %v174_v22 = vpack.c.bf16 %v25_v21, %v24_v20  ;;  %v27_v24 = vld [vmem:[%s254_s1 + $0x78] sm:$0xff]  ;;  %v11_v26 = vld [vmem:[%s255_s0] sm:$0xff] }
   0x7   :  { %v177_v25 = vpack.c.bf16 %v27_v24, %v26_v23 }
   0x8   :  { %160 = vmatpush3.bf16.msra.mxu0 %v159_v7 }
   0x9   :  { %161 = vmatprep.subr.bf16.mxu0 %v182_v0 }
   0xc   :  { %163 = vmatpush3.bf16.msra.mxu0 %v162_v10 }
   0xd   :  { %164 = vmatprep.subr.bf16.mxu0 %v182_v0 }
  0x10   :  { %166 = vmatpush3.bf16.msra.mxu0 %v165_v13 }
  0x11   :  { %167 = vmatprep.subr.bf16.mxu0 %v182_v0 }
  0x14   :  { %169 = vmatpush3.bf16.msra.mxu0 %v168_v16 }
  0x15   :  { %170 = vmatprep.subr.bf16.mxu0 %v182_v0 }
  0x18   :  { %172 = vmatpush3.bf16.msra.mxu0 %v171_v19 }
  0x19   :  { %173 = vmatprep.subr.bf16.mxu0 %v182_v0 }
  0x1c   :  { %175 = vmatpush3.bf16.msra.mxu0 %v174_v22 }
  0x1d   :  { %176 = vmatprep.subr.bf16.mxu0 %v182_v0 }
  0x20   :  { %178 = vmatpush3.bf16.msra.mxu0 %v177_v25 }
  0x23   :  { %153 = vmatmul.mubr.f32.vlgmr.msra.gmra.mrb[0].mxu0 %v11_v26 }
  0xf6   :  { %v94_v27 = vpop.f32.mrb[0].mxu0 }
  0xf7   :  { %98 = vst [vmem:[%s256_s2] sm:$0xff] %v94_v27  ;;  %v154_v28 = vpop.f32.mrb[1].mxu0 }

// kernel: _trend_period_forward.6
= control target key start
LH: loop header
LB: loop body
LE: loop exit
PB: predicated region body
PF: predicated region fallthrough
CT: control target
= control target key end

     0   :  { %s541_s18 = smov 0   ;;  %s590_s0 = inlined_call_operand.vmem [shape: f32[48,9], index: 0, kind: input, shape index: {}]   ;;  %s591_s1 = inlined_call_operand.vmem [shape: f32[9,128], index: 1, kind: input, shape index: {}]   ;;  %s592_s2 = inlined_call_operand.vmem [shape: f32[1,128], index: 2, kind: input, shape index: {}]   ;;  %s593_s3 = inlined_call_operand.vmem [shape: f32[48,128], index: 3, kind: output, shape index: {0}]   ;;  %s594_s4 = inlined_call_operand.vmem [shape: f32[1,128], index: 4, kind: output, shape index: {1}]   ;;  %s595_s5 = inlined_call_operand.vmem [shape: f32[1,128], index: 5, kind: output, shape index: {2}]  }
   0x1 LB: > { %s547_s19 = sadd.s32 4294967295, %s504_s18   ;;  %p450_p0 = scmp.ge.s32.totalorder %s504_s18, 1  ;;  %s504_s18 = sphi %s541_s18, %s16_s18  }
   0x2   : > { %p183_p1 = scmp.lt.s32.totalorder %s504_s18, 3 }
   0x4   : > { %p184_p2 = pnand %p450_p0, %p183_p1 }
   0x5   : > { %v226_v0 = vld [vmem:[%s591_s1] sm:$0xff] (!%p184_p2)  ;;  %v227_v1 = vld [vmem:[%s591_s1 + $0x8] sm:$0x1] (!%p184_p2)  ;;  %vm245_vm0 = vcmask (!%p184_p2), 1040384   ;;  %v506_v2 = vmov (!%p184_p2), 0.0|0.0   ;;  %vm507_vm1 = vmmov (!%p184_p2), 1   ;;  %v333_v8 = vlaneseq (!%p184_p2) }
   0x6   : > { %187 = sbr.rel (%p184_p2) target bundleno = 257 (0x101), region = 32  ;;  %483 = vmatprep.subr.bf16.mxu1 (!%p184_p2), %v506_v2  ;;  %v480_v3 = vpack.c.bf16 (!%p184_p2), %v227_v1, %v226_v0  ;;  %vm481_vm2 = vmpackc.low (!%p184_p2), %vm245_vm0, %vm507_vm1  ;;  %479 = vmatprep.subr.bf16.mxu0 (!%p184_p2), %v506_v2  ;;  %vm508_vm3 = vmmov (!%p184_p2), 0   ;;  %v509_v4 = vmov (!%p184_p2), 0.0   ;;  %vm235_vm4 = vcmask (!%p184_p2), 72704   ;;  %v453_v15 = vld [vmem:[%s592_s2] ss:$0 sm:$0xff] (!%p184_p2) }
   0x7   : > { %s211_s24 = smul.u32 (!%p184_p2), 3, %s547_s19  ;;  %473 = vmatprep.mubr.msk.f32.mxu1 (!%p184_p2), %vm508_vm3, %v509_v4  ;;  %470 = vmatprep.mubr.msk.f32.mxu0 (!%p184_p2), %vm508_vm3, %v509_v4  ;;  %v334_v9 = vshrl.u32 (!%p184_p2), %v333_v8, 7  ;;  %p458_p4 = scmp.ne.s32.totalorder (!%p184_p2), %s547_s19, 0 }
   0x8   : > { %484 = vmatpush3.bf16.msk.msra.mxu1 (!%p184_p2), %vm481_vm2, %v480_v3  ;;  %482 = vmatpush3.bf16.msk.msra.mxu0 (!%p184_p2), %vm481_vm2, %v480_v3  ;;  %s332_s29 = smul.u32 (!%p184_p2), 24, %s547_s19 }
   0x9   : > { %p212_p3 = scmp.lt.s32.totalorder (!%p184_p2), %s211_s24, 5  ;;  %v335_v10 = vadd.s32 (!%p184_p2), 8, %v334_v9  ;;  %v336_v14 = vadd.s32 (!%p184_p2), 16, %v334_v9 }
   0xa   : > { %v337_v11 = vstv (!%p184_p2), %s332_s29 }
   0xb   : > { %v339_v12 = vadd.s32 (!%p184_p2), %v337_v11, %v335_v10  ;;  %v338_v13 = vadd.s32 (!%p184_p2), %v337_v11, %v334_v9  ;;  %v340_v18 = vadd.s32 (!%p184_p2), %v337_v11, %v336_v14 }
   0xd   : > { %s597_s24 = smov (!%p212_p3, %s211_s24), 5  ;;  %vm342_vm5 = vcmp.lt.s32.totalorder %v339_v12, 48  ;;  %vm341_vm6 = vcmp.lt.s32.totalorder %v338_v13, 48  ;;  %vm343_vm7 = vcmp.lt.s32.totalorder %v340_v18, 48  ;;  %v510_v29 = vmov (!%p458_p4), 0.0  }
   0xe   : > { %s451_s25 = sshll.u32 %s597_s24, 3  ;;  %351 = vst [vmem:[%s594_s4] sm:$0x1] (!%p458_p4), %v510_v29  ;;  %352 = vst [vmem:[%s595_s5] sm:$0x1] (!%p458_p4), %v510_v29 }
   0xf   : > { %s215_s28 = scalar_lea.vmem %s590_s0, %s451_s25  ;;  %s221_s9 = scalar_lea.vmem %s593_s3, %s451_s25 }
  0x10   : > { %v224_v5 = vld [vmem:[%s215_s28 + $0x8] sm:$0xff]  ;;  %v223_v6 = vld [vmem:[%s215_s28] sm:$0xff]  ;;  %v225_v7 = vld [vmem:[%s215_s28 + $0x10] sm:$0xff] }
  0x11   : > { %474 = vmatmul.mubr.msk.f32.vlgmr.msra.gmra.mrb[0].mxu1 %vm235_vm4, %v224_v5  ;;  %471 = vmatmul.mubr.msk.f32.vlgmr.msra.gmra.mrb[0].mxu0 %vm235_vm4, %v223_v6 }
  0x12   : > { %476 = vmatprep.mubr.msk.f32.mxu1 %vm508_vm3, %v509_v4 }
  0x15   : > { %477 = vmatmul.mubr.msk.f32.gmra.mrb[2].mxu1 %vm235_vm4, %v225_v7 }
  0xe4   : > { %v320_v16 = vpop.f32.mrb[0].mxu1  ;;  %v315_v17 = vpop.f32.mrb[0].mxu0 }
  0xe5   : > { %v321_v19 = vadd.f32 %v453_v15, %v320_v16  ;;  %v475_v20 = vpop.f32.mrb[1].mxu1  ;;  %v316_v21 = vadd.f32 %v453_v15, %v315_v17  ;;  %v472_v22 = vpop.f32.mrb[1].mxu0  ;;  %350 = sbr.rel (%p458_p4) target bundleno = 236 (0xec), region = 36 }
  0xe7   : > { %330 = vst [vmem:[%s221_s9 + $0x8] sm:$0xff] %v321_v19  ;;  %v345_v23 = vsel %vm342_vm5, %v321_v19, 0.0  ;;  %329 = vst [vmem:[%s221_s9] sm:$0xff] %v316_v21  ;;  %v344_v24 = vsel %vm341_vm6, %v316_v21, 0.0 }
  0xe8   : > { %v325_v25 = vpop.f32.mrb[2].mxu1 }
  0xe9   : > { %v326_v26 = vadd.f32 %v453_v15, %v325_v25  ;;  %v478_v27 = vpop.f32.mrb[3].mxu1 }
  0xeb   : > { %331 = vst [vmem:[%s221_s9 + $0x10] sm:$0xff] %v326_v26  ;;  %v346_v28 = vsel %vm343_vm7, %v326_v26, 0.0 }
  0xec PF: > { %v354_v30 = vadd.f32 %v345_v23, %v344_v24  ;;  %v365_v31 = vmul.f32 %v344_v24, %v344_v24  ;;  %v366_v32 = vmul.f32 %v345_v23, %v345_v23  ;;  %v367_v33 = vmul.f32 %v346_v28, %v346_v28  ;;  %v353_v46 = vld [vmem:[%s594_s4] sm:$0x1] }
  0xed   : > { %v364_v49 = vld [vmem:[%s595_s5] sm:$0x1] }
  0xee   : > { %v355_v34 = vadd.f32 %v354_v30, %v346_v28  ;;  %v368_v35 = vadd.f32 %v366_v32, %v365_v31 }
  0xf0   : > { %v356_v36 = vrot.slane %v355_v34, 4  ;;  %v369_v37 = vadd.f32 %v368_v35, %v367_v33 }
  0xf2   : > { %v357_v38 = vadd.f32 %v356_v36, %v355_v34  ;;  %v370_v39 = vrot.slane %v369_v37, 4 }
  0xf4   : > { %v358_v40 = vrot.slane %v357_v38, 2  ;;  %v371_v41 = vadd.f32 %v370_v39, %v369_v37 }
  0xf6   : > { %v359_v42 = vadd.f32 %v358_v40, %v357_v38  ;;  %v372_v43 = vrot.slane %v371_v41, 2 }
  0xf8   : > { %v360_v44 = vrot.slane %v359_v42, 1  ;;  %v373_v45 = vadd.f32 %v372_v43, %v371_v41 }
  0xfa   : > { %v361_v47 = vadd.f32 %v360_v44, %v359_v42  ;;  %v374_v48 = vrot.slane %v373_v45, 1 }
  0xfc   : > { %v362_v50 = vadd.f32 %v361_v47, %v353_v46  ;;  %v375_v51 = vadd.f32 %v374_v48, %v373_v45 }
  0xfe   : > { %363 = vst [vmem:[%s594_s4] sm:$0x1] %v362_v50  ;;  %v376_v52 = vadd.f32 %v375_v51, %v364_v49 }
 0x100   : > { %377 = vst [vmem:[%s595_s5] sm:$0x1] %v376_v52 }
 0x101 PF: > { %s16_s18 = sadd.s32 1, %s504_s18  }
 0x102   : > { %p13_p5 = scmp.ge.s32.totalorder %s16_s18, 4  }
 0x104   :  { %15 = sbr.rel (!%p13_p5) target bundleno = 1 (0x1), region = 82 }

// kernel: _trend_period_forward.7
= control target key start
LH: loop header
LB: loop body
LE: loop exit
PB: predicated region body
PF: predicated region fallthrough
CT: control target
= control target key end

     0   :  { %16 = vsyncpa [#allocation3], 0  ;;  %s1429_s0 = inlined_call_operand.vmem [shape: f32[48,128], index: 0, kind: input, shape index: {}]   ;;  %s1430_s1 = inlined_call_operand.vmem [shape: f32[1,128], index: 1, kind: input, shape index: {}]   ;;  %s1431_s2 = inlined_call_operand.vmem [shape: f32[1,128], index: 2, kind: input, shape index: {}]   ;;  %s1432_s3 = inlined_call_operand.vmem [shape: f32[1,128], index: 3, kind: input, shape index: {}]   ;;  %s1433_s4 = inlined_call_operand.vmem [shape: f32[1,128], index: 4, kind: input, shape index: {}, may-alias: {4,10}]   ;;  %s1434_s5 = inlined_call_operand.vmem [shape: bf16[128,128], index: 5, kind: input, shape index: {}]   ;;  %s1435_s6 = inlined_call_operand.vmem [shape: f32[1,128], index: 6, kind: input, shape index: {}]   ;;  %s1436_s7 = inlined_call_operand.vmem [shape: bf16[128,128], index: 7, kind: input, shape index: {}]   ;;  %s1437_s8 = inlined_call_operand.vmem [shape: f32[1,128], index: 8, kind: input, shape index: {}]   ;;  %s1438_s9 = inlined_call_operand.vmem [shape: bf16[128,128], index: 9, kind: input, shape index: {}]   ;;  %s1439_s10 = inlined_call_operand.vmem [shape: f32[1,128], index: 10, kind: input, shape index: {}, may-alias: {4,10}]   ;;  %s1440_s11 = inlined_call_operand.hbm [shape: f32[48,128], index: 11, kind: output, shape index: {}]  }
   0x1   :  { %18 = vsyncpa [#allocation3 + $0x1], 0  ;;  %s1221_s17 = smov 0   ;;  %s1223_s18 = smov 0  }
   0x2   :  { %s1225_s19 = smov 0   ;;  %s1227_s20 = smov 0  }
   0x3 LB: > { %s1242_s21 = sadd.s32 4294967295, %s1156_s20   ;;  %s892_s22 = sadd.s32 4294967294, %s1156_s20   ;;  %s1156_s20 = sphi %s1227_s20, %s1448_s20   ;;  %s1152_s19 = sphi %s1225_s19, %s1447_s19   ;;  %s1148_s18 = sphi %s1223_s18, %s1446_s18   ;;  %s1144_s17 = sphi %s1221_s17, %s1445_s17  }
   0x4   : > { %s1246_s23 = sadd.s32 1, %s1156_s20   ;;  %s267_s24 = sadd.s32 1, %s1152_s19 }
   0x5   : > { %s264_s25 = ssub.s32 %s1156_s20, %s1246_s23  ;;  %p277_p0 = scmp.ne.s32.totalorder %s1152_s19, %s1148_s18 }
   0x6   : > { %p265_p1 = scmp.eq.s32.totalorder %s264_s25, 0  ;;  %p278_p2 = scmp.eq.s32.totalorder %s1242_s21, 1 }
   0x7   : > { %p283_p3 = scmp.ne.s32.totalorder %s1148_s18, %s1144_s17  ;;  %p284_p4 = scmp.eq.s32.totalorder %s892_s22, 1 }
   0x8   : > { %s1257_s26 = scalar_select %p265_p1, %s1152_s19, %s267_s24  }
   0x9   : > { %p1259_p5 = por %p278_p2, %p277_p0  ;;  %p1263_p6 = por %p284_p4, %p283_p3 }
   0xa   : > { %1441 = sst [smem:[#allocation5_spill]] %s1257_s26  ;;  %p895_p7 = scmp.ge.s32.totalorder %s1156_s20, 1 }
   0xb   : > { %p341_p8 = scmp.lt.s32.totalorder %s1156_s20, 3 }
   0xd   : > { %p342_p9 = pnand %p895_p7, %p341_p8 }
   0xe   : > { %v1064_v0 = vld [vmem:[%s1434_s5] sm:$0xff] (!%p342_p9)   ;;  %s381_s12 = smul.u32 (!%p342_p9), 3, %s1242_s21  ;;  %v1065_v1 = vld [vmem:[%s1434_s5 + $0x8] sm:$0xff] (!%p342_p9)   ;;  %v1066_v2 = vld [vmem:[%s1434_s5 + $0x10] sm:$0xff] (!%p342_p9)  }
   0xf   : > { %345 = sbr.rel (%p342_p9) target bundleno = 738 (0x2e2), region = 64  ;;  %962 = vmatprep.subr.bf16.mxu0 (!%p342_p9), %v1064_v0  ;;  %v1067_v3 = vld [vmem:[%s1434_s5 + $0x18] sm:$0xff] (!%p342_p9)   ;;  %v897_v6 = vld [vmem:[%s1430_s1] ss:$0 sm:$0xff] (!%p342_p9)  ;;  %v1073_v17 = vld [vmem:[%s1436_s7 + $0x8] sm:$0xff] (!%p342_p9)  }
  0x10   : > { %p382_p10 = scmp.lt.s32.totalorder (!%p342_p9), %s381_s12, 5  ;;  %963 = vmatpush3.bf16.msra.mxu0 (!%p342_p9), %v1064_v0  ;;  %v898_v9 = vld [vmem:[%s1431_s2] ss:$0 sm:$0xff] (!%p342_p9)  ;;  %v1069_v20 = vld [vmem:[%s1434_s5 + $0x28] sm:$0xff] (!%p342_p9)   ;;  %v1070_v25 = vld [vmem:[%s1434_s5 + $0x30] sm:$0xff] (!%p342_p9)   ;;  %s931_s15 = smul.u32 (!%p342_p9), 384, %s1242_s21 }
  0x11   : > { %964 = vmatprep.subr.bf16.mxu0 (!%p342_p9), %v1065_v1  ;;  %v899_v10 = vld [vmem:[%s1432_s3] ss:$0 sm:$0xff] (!%p342_p9)  ;;  %v1071_v28 = vld [vmem:[%s1434_s5 + $0x38] sm:$0xff] (!%p342_p9)   ;;  %v1074_v31 = vld [vmem:[%s1436_s7 + $0x10] sm:$0xff] (!%p342_p9)  }
  0x12   : > { %v1068_v11 = vld [vmem:[%s1434_s5 + $0x20] sm:$0xff] (!%p342_p9)   ;;  %v1075_v32 = vld [vmem:[%s1436_s7 + $0x18] sm:$0xff] (!%p342_p9)   ;;  %v1077_v34 = vld [vmem:[%s1436_s7 + $0x28] sm:$0xff] (!%p342_p9)   ;;  %s1386_s25 = scalar_lea.hbm (!%p342_p9), %s1440_s11, %s931_s15 }
  0x13   : > { %v900_v12 = vld [vmem:[%s1433_s4] ss:$0 sm:$0xff] (!%p342_p9)  ;;  %v1078_v35 = vld [vmem:[%s1436_s7 + $0x30] sm:$0xff] (!%p342_p9)   ;;  %v1079_v36 = vld [vmem:[%s1436_s7 + $0x38] sm:$0xff] (!%p342_p9)  }
  0x14   : > { %965 = vmatpush3.bf16.msra.mxu0 (!%p342_p9), %v1065_v1  ;;  %v1072_v16 = vld [vmem:[%s1436_s7] sm:$0xff] (!%p342_p9)   ;;  %v1081_v38 = vld [vmem:[%s1438_s9 + $0x8] sm:$0xff] (!%p342_p9)   ;;  %v1082_v39 = vld [vmem:[%s1438_s9 + $0x10] sm:$0xff] (!%p342_p9)  }
  0x15   : > { %966 = vmatprep.subr.bf16.mxu0 (!%p342_p9), %v1066_v2  ;;  %982 = vmatprep.subr.bf16.mxu1 (!%p342_p9), %v1072_v16  ;;  %v1076_v33 = vld [vmem:[%s1436_s7 + $0x20] sm:$0xff] (!%p342_p9)   ;;  %v1083_v40 = vld [vmem:[%s1438_s9 + $0x18] sm:$0xff] (!%p342_p9)   ;;  %v1085_v42 = vld [vmem:[%s1438_s9 + $0x28] sm:$0xff] (!%p342_p9)  }
  0x16   : > { %s1450_s12 = smov (!%p382_p10, %s381_s12), 5  ;;  %983 = vmatpush3.bf16.msra.mxu1 %v1072_v16  ;;  %v1080_v37 = vld [vmem:[%s1438_s9] sm:$0xff]  }
  0x17   : > { %s896_s22 = sshll.u32 %s1450_s12, 3  ;;  %984 = vmatprep.subr.bf16.mxu1 %v1073_v17  ;;  %v1084_v41 = vld [vmem:[%s1438_s9 + $0x20] sm:$0xff]  }
  0x18   : > { %s385_s13 = scalar_lea.vmem %s1429_s0, %s896_s22  ;;  %967 = vmatpush3.bf16.msra.mxu0 %v1066_v2  ;;  %v901_v43 = vld [vmem:[%s1435_s6] ss:$0 sm:$0xff]  ;;  %s378_s22 = sand.u32 1, %s1148_s18  }
  0x19   : > { %v389_v4 = vld [vmem:[%s385_s13] sm:$0xff]  ;;  %v390_v5 = vld [vmem:[%s385_s13 + $0x8] sm:$0xff]  ;;  %v391_v13 = vld [vmem:[%s385_s13 + $0x10] sm:$0xff]  ;;  %968 = vmatprep.subr.bf16.mxu0 %v1067_v3  ;;  %s1022_s30 = smul.u32 24, %s378_s22  ;;  %s1388_s21 = scalar_lea.sflag [#allocation3], %s378_s22 }
  0x1a   : > { %v399_v7 = vsub.f32 %v389_v4, %v897_v6  ;;  %v400_v8 = vsub.f32 %v390_v5, %v897_v6  ;;  %v401_v21 = vsub.f32 %v391_v13, %v897_v6  ;;  %985 = vmatpush3.bf16.msra.mxu1 %v1073_v17  ;;  %v1086_v4 = vld [vmem:[%s1438_s9 + $0x30] sm:$0xff]   ;;  %v1087_v5 = vld [vmem:[%s1438_s9 + $0x38] sm:$0xff]   ;;  %v910_v6 = vld [vmem:[%s1437_s8] ss:$0 sm:$0xff] }
  0x1b   : > { %986 = vmatprep.subr.bf16.mxu1 %v1074_v31  ;;  %s380_s12 = scalar_lea.vmem [#allocation2], %s1022_s30  ;;  %s1158_s30 = smov [#allocation2]  }
  0x1c   : > { %v409_v14 = vmul.f32 %v898_v9, %v399_v7  ;;  %v410_v15 = vmul.f32 %v898_v9, %v400_v8  ;;  %969 = vmatpush3.bf16.msra.mxu0 %v1067_v3  ;;  %v411_v26 = vmul.f32 %v898_v9, %v401_v21  ;;  %s830_s16 = sshll.u32 %s380_s12, 4  ;;  %s1098_s26 = sshll.u32 %s1158_s30, 4  ;;  %s1381_s16 = int_to_ptr.vmem [resolvable:$true] %s830_s16  ;;  %s1099_s26 = int_to_ptr.vmem [resolvable:$false] %s1098_s26 }
  0x1d   : > { %970 = vmatprep.subr.bf16.mxu0 %v1068_v11  ;;  %s1094_s29 = scalar_lea.vmem %s1381_s16, 384  ;;  %s1100_s14 = scalar_lea.vmem %s1099_s26, 768 }
  0x1e   : > { %v419_v18 = vmul.f32 %v899_v10, %v409_v14  ;;  %v420_v19 = vmul.f32 %v899_v10, %v410_v15  ;;  %v421_v27 = vmul.f32 %v899_v10, %v411_v26  ;;  %987 = vmatpush3.bf16.msra.mxu1 %v1074_v31  ;;  %p1095_p11 = scmp.ne.s32.totalorder %s1381_s16, %s1094_s29  ;;  %p1101_p0 = scmp.lt.s32.totalorder %s1381_s16, %s1099_s26 }
  0x1f   : > { %988 = vmatprep.subr.bf16.mxu1 %v1075_v32  ;;  %p1102_p1 = scmp.lt.s32.totalorder %s1100_s14, %s1094_s29 }
  0x20   : > { %v1309_v22 = vadd.f32 %v900_v12, %v419_v18  ;;  %v1311_v23 = vadd.f32 %v900_v12, %v420_v19  ;;  %971 = vmatpush3.bf16.msra.mxu0 %v1068_v11  ;;  %v1321_v29 = vadd.f32 %v900_v12, %v421_v27  ;;  %v919_v19 = vld [vmem:[%s1439_s10] ss:$0 sm:$0xff]  ;;  %p1096_p12 = pnand %p1095_p11, %p1259_p5 }
  0x21   : > { %972 = vmatprep.subr.bf16.mxu0 %v1069_v20  ;;  %p1103_p2 = por %p1102_p1, %p1101_p0 }
  0x22   : > { %v432_v24 = vpack.c.bf16 %v1311_v23, %v1309_v22  ;;  %v433_v30 = vpack.c.bf16 %v1321_v29, %v1321_v29  ;;  %989 = vmatpush3.bf16.msra.mxu1 %v1075_v32  ;;  %p1097_p13 = pneg %p1096_p12 }
  0x23   : > { %990 = vmatprep.subr.bf16.mxu1 %v1076_v33 }
  0x24   : > { %978 = vmatprep.mubr.bf16.mxu0 %v432_v24  ;;  %973 = vmatpush3.bf16.msra.mxu0 %v1069_v20  ;;  %p1104_p3 = pnand %p1103_p2, %p1097_p13 }
  0x25   : > { %974 = vmatprep.subr.bf16.mxu0 %v1070_v25 }
  0x26   : > { %991 = vmatpush3.bf16.msra.mxu1 %v1076_v33 }
  0x27   : > { %992 = vmatprep.subr.bf16.mxu1 %v1077_v34 }
  0x28   : > { %975 = vmatpush3.bf16.msra.mxu0 %v1070_v25 }
  0x29   : > { %976 = vmatprep.subr.bf16.mxu0 %v1071_v28 }
  0x2a   : > { %993 = vmatpush3.bf16.msra.mxu1 %v1077_v34 }
  0x2b   : > { %994 = vmatprep.subr.bf16.mxu1 %v1078_v35 }
  0x2c   : > { %977 = vmatpush3.bf16.msra.mxu0 %v1071_v28 }
  0x2d   : > { %1002 = vmatprep.subr.bf16.mxu0 %v1080_v37 }
  0x2e   : > { %995 = vmatpush3.bf16.msra.mxu1 %v1078_v35 }
  0x2f   : > { %979 = vmatmul.mubr.bf16.vlgmr.msra.gmra.mrb[0].mxu0 %v433_v30  ;;  %996 = vmatprep.subr.bf16.mxu1 %v1079_v36 }
  0x30   : > { %1003 = vmatpush3.bf16.msra.mxu0 %v1080_v37 }
  0x31   : > { %1004 = vmatprep.subr.bf16.mxu0 %v1081_v38 }
  0x32   : > { %997 = vmatpush3.bf16.msra.mxu1 %v1079_v36 }
  0x34   : > { %1005 = vmatpush3.bf16.msra.mxu0 %v1081_v38 }
  0x35   : > { %1006 = vmatprep.subr.bf16.mxu0 %v1082_v39 }
  0x38   : > { %1007 = vmatpush3.bf16.msra.mxu0 %v1082_v39 }
  0x39   : > { %1008 = vmatprep.subr.bf16.mxu0 %v1083_v40 }
  0x3c   : > { %1009 = vmatpush3.bf16.msra.mxu0 %v1083_v40 }
  0x3d   : > { %1010 = vmatprep.subr.bf16.mxu0 %v1084_v41 }
  0x40   : > { %1011 = vmatpush3.bf16.msra.mxu0 %v1084_v41 }
  0x41   : > { %1012 = vmatprep.subr.bf16.mxu0 %v1085_v42 }
  0x44   : > { %1013 = vmatpush3.bf16.msra.mxu0 %v1085_v42 }
  0x45   : > { %1014 = vmatprep.subr.bf16.mxu0 %v1086_v4 }
  0x48   : > { %1015 = vmatpush3.bf16.msra.mxu0 %v1086_v4 }
  0x49   : > { %1016 = vmatprep.subr.bf16.mxu0 %v1087_v5 }
  0x4c   : > { %1017 = vmatpush3.bf16.msra.mxu0 %v1087_v5 }
 0x102   : > { %v980_v44 = vpop.f32.mrb[0].mxu0 }
 0x103   : > { %v548_v45 = vadd.f32 %v980_v44, %v901_v43  ;;  %v539_v46 = vpop.f32.mrb[1].mxu0 }
 0x104   : > { %v540_v47 = vadd.f32 %v901_v43, %v539_v46  ;;  %v981_v48 = vpop.f32.mrb[2].mxu0 }
 0x105   : > { %v558_v49 = vmul.f32 0.70710677, %v548_v45  ;;  %v542_v50 = vpop.f32.mrb[3].mxu0  ;;  %v555_v59 = vmul.f32 0.5, %v548_v45 }
 0x106   : > { %v556_v51 = vmul.f32 0.70710677, %v540_v47  ;;  %v543_v52 = vadd.f32 %v901_v43, %v542_v50  ;;  %v553_v60 = vmul.f32 0.5, %v540_v47 }
 0x107   : > { %1088 = verf.f32 %v558_v49 }
 0x108   : > { %1090 = verf.f32 %v556_v51  ;;  %v557_v53 = vmul.f32 0.70710677, %v543_v52  ;;  %v554_v61 = vmul.f32 0.5, %v543_v52 }
 0x10a   : > { %1092 = verf.f32 %v557_v53 }
 0x111   : > { %v1089_v54 = vpop.eup %1088 }
 0x112   : > { %v1091_v55 = vpop.eup %1090  ;;  %v564_v56 = vadd.f32 1.0, %v1089_v54 }
 0x113   : > { %v562_v57 = vadd.f32 1.0, %v1091_v55 }
 0x114   : > { %v1093_v58 = vpop.eup %1092  ;;  %v567_v63 = vmul.f32 %v564_v56, %v555_v59 }
 0x115   : > { %v563_v62 = vadd.f32 1.0, %v1093_v58  ;;  %v565_v0 = vmul.f32 %v562_v57, %v553_v60 }
 0x116   : > { %v569_v3 = vpack.c.bf16 %v567_v63, %v567_v63 }
 0x117   : > { %v566_v1 = vmul.f32 %v563_v62, %v554_v61 }
 0x119   : > { %v568_v2 = vpack.c.bf16 %v566_v1, %v565_v0 }
 0x11b   : > { %998 = vmatprep.mubr.bf16.mxu1 %v568_v2 }
 0x11c   : > { %999 = vmatmul.mubr.bf16.vlgmr.msra.gmra.mrb[0].mxu1 %v569_v3 }
 0x1ef   : > { %v1000_v7 = vpop.f32.mrb[0].mxu1 }
 0x1f0   : > { %v684_v8 = vadd.f32 %v1000_v7, %v910_v6  ;;  %v675_v9 = vpop.f32.mrb[1].mxu1 }
 0x1f1   : > { %v676_v10 = vadd.f32 %v910_v6, %v675_v9  ;;  %v1001_v11 = vpop.f32.mrb[2].mxu1 }
 0x1f2   : > { %v678_v12 = vpop.f32.mrb[3].mxu1  ;;  %v691_v14 = vadd.f32 %v684_v8, %v1321_v29 }
 0x1f3   : > { %v679_v13 = vadd.f32 %v910_v6, %v678_v12  ;;  %v689_v15 = vadd.f32 %v676_v10, %v1309_v22 }
 0x1f4   : > { %v693_v18 = vpack.c.bf16 %v691_v14, %v691_v14 }
 0x1f5   : > { %v690_v16 = vadd.f32 %v679_v13, %v1311_v23 }
 0x1f7   : > { %v692_v17 = vpack.c.bf16 %v690_v16, %v689_v15 }
 0x1f9   : > { %1018 = vmatprep.mubr.bf16.mxu0 %v692_v17 }
 0x1fa   : > { %1019 = vmatmul.mubr.bf16.vlgmr.msra.gmra.mrb[4].mxu0 %v693_v18 }
 0x2cd   : > { %v1020_v20 = vpop.f32.mrb[4].mxu0 }
 0x2ce   : > { %v808_v21 = vadd.f32 %v1020_v20, %v919_v19  ;;  %v799_v24 = vpop.f32.mrb[5].mxu0 }
 0x2cf   : > { %v800_v22 = vadd.f32 %v919_v19, %v799_v24  ;;  %v1021_v25 = vpop.f32.mrb[6].mxu0 }
 0x2d0   : > { %815 = vst [vmem:[%s380_s12 + $0x10] sm:$0xff] %v808_v21  ;;  %v802_v23 = vpop.f32.mrb[7].mxu0 }
 0x2d1   : > { %813 = vst [vmem:[%s380_s12] sm:$0xff] %v800_v22  ;;  %v803_v26 = vadd.f32 %v919_v19, %v802_v23 }
 0x2d3   : > { %814 = vst [vmem:[%s380_s12 + $0x8] sm:$0xff] %v803_v26 }
 0x2d4   : > { %1107 = shalt.err (!%p1104_p3)
}
 0x2d5   : > { %s1108_s22 = scalar_lea.hbm %s1386_s25, 384  ;;  %s1112_s24 = scalar_lea.hbm %s1440_s11, 768 }
 0x2d6   : > { %p1109_p4 = scmp.ne.s32.totalorder %s1386_s25, %s1108_s22  ;;  %p1113_p9 = scmp.lt.u32.totalorder %s1386_s25, %s1440_s11 }
 0x2d7   : > { %p1114_p10 = scmp.lt.u32.totalorder %s1112_s24, %s1108_s22  ;;  %p1116_p12 = scmp.lt.u32.totalorder %s1108_s22, %s1386_s25 }
 0x2d8   : > { %p1110_p7 = pnand %p1109_p4, %p1259_p5 }
 0x2d9   : > { %p1115_p11 = por %p1114_p10, %p1113_p9 }
 0x2da   : > { %p1111_p8 = pneg %p1110_p7 }
 0x2db   : > { %p1117_p13 = por %p1116_p12, %p1115_p11 }
 0x2dd   : > { %p1118_p0 = pnand %p1117_p13, %p1111_p8 }
 0x2df   : > { %1121 = shalt.err (!%p1118_p0)
}
 0x2e0   : > { %s1159_s29 = smov 128   ;;  %s1160_s26 = smov 8  }
 0x2e1   : > { %1023 = dma.vmem_to_hbm [thread:$0]  (%p1259_p5), %s1381_s16, 384, %s1386_s25, %s1388_s21, %s1159_s29, %s1159_s29, %s1160_s26  }
 0x2e2 PF: > { %p1029_p1 = scmp.ge.s32.totalorder %s1156_s20, 2  ;;  %s845_s14 = sand.u32 1, %s1144_s17  }
 0x2e3   : > { %s846_s22 = scalar_lea.sflag [#allocation3], %s845_s14 }
 0x2e4   : > { %p1026_p2 = pnand %p1029_p1, %p1263_p6 }
 0x2e6   : > { %1139 = dma.done.wait (!%p1026_p2), %s846_s22, 384  }
 0x2e7   : > { %1141 = vsyncadd (!%p1026_p2), %s846_s22, 4294966912  ;;  %s1444_s15 = sld [smem:[#allocation5_spill]]  ;;  %p21_p3 = scmp.ge.s32.totalorder %s1246_s23, 4  }
 0x2e8   : > { %s1445_s17 = smov %s1148_s18  ;;  %s1446_s18 = smov %s1152_s19 }
 0x2e9   : > { %s1448_s20 = smov %s1246_s23  ;;  %23 = sbr.rel (!%p21_p3) target bundleno = 3 (0x3), region = 99 }
 0x2ed   : > { %s1447_s19 = smov %s1444_s15 }
 0x2f0   :  { %851 = vsyncpa [#allocation3], 1 }
 0x2f1   :  { %853 = vsyncpa [#allocation3 + $0x1], 1 }

// kernel: _trend_period_forward.9
= control target key start
LH: loop header
LB: loop body
LE: loop exit
PB: predicated region body
PF: predicated region fallthrough
CT: control target
= control target key end

     0   :  { %10 = vsyncpa [#allocation3], 0  ;;  %s244_s0 = inlined_call_operand.vmem [shape: f32[8,128], index: 0, kind: input, shape index: {}]   ;;  %s245_s1 = inlined_call_operand.vmem [shape: f32[8,1], index: 1, kind: input, shape index: {}]   ;;  %s246_s2 = inlined_call_operand.vmem [shape: f32[8,1], index: 2, kind: input, shape index: {}]   ;;  %s247_s3 = inlined_call_operand.vmem [shape: f32[3], index: 3, kind: input, shape index: {}]   ;;  %s248_s4 = inlined_call_operand.vmem [shape: f32[3], index: 4, kind: input, shape index: {}]   ;;  %s249_s5 = inlined_call_operand.vmem [shape: f32[3,8,128], index: 5, kind: output, shape index: {}]  }
   0x1   :  { %s24_s20 = sshll.u32 %s247_s3, 4  ;;  %s25_s20 = int_to_ptr.vmem [resolvable:$true] %s24_s20 }
   0x2   :  { %11 = vsyncpa [#allocation5], 0  ;;  %s34_s23 = sshll.u32 %s248_s4, 4  ;;  %s159_s24 = scalar_lea.vmem %s25_s20, 16  ;;  %s35_s23 = int_to_ptr.vmem [resolvable:$true] %s34_s23 }
   0x3   :  { %p160_p0 = scmp.ne.s32.totalorder %s25_s20, %s159_s24  ;;  %p164_p1 = scmp.lt.s32.totalorder %s25_s20, %s25_s20 }
   0x4   :  { %p165_p2 = scmp.lt.s32.totalorder %s159_s24, %s159_s24 }
   0x6   :  { %p166_p3 = por %p165_p2, %p164_p1 }
   0x8   :  { %p167_p4 = pnand %p166_p3, %p160_p0 }
   0xa   :  { %170 = shalt.err (!%p167_p4)
}
   0xb   :  { %s187_s25 = smov [#allocation2]   ;;  %s171_s26 = scalar_lea.vmem %s35_s23, 16 }
   0xc   :  { %27 = dma.vmem_to_smem %s25_s20, 16, %s187_s25, [#allocation3]  }
   0xd   :  { %p172_p5 = scmp.ne.s32.totalorder %s35_s23, %s171_s26  ;;  %p176_p6 = scmp.lt.s32.totalorder %s35_s23, %s35_s23 }
   0xe   :  { %p177_p7 = scmp.lt.s32.totalorder %s171_s26, %s171_s26 }
  0x10   :  { %p178_p8 = por %p177_p7, %p176_p6 }
  0x12   :  { %p179_p9 = pnand %p178_p8, %p172_p5 }
  0x14   :  { %182 = shalt.err (!%p179_p9)
}
  0x15   :  { %s188_s3 = smov [#allocation4]  }
  0x16   :  { %37 = dma.vmem_to_smem %s35_s23, 16, %s188_s3, [#allocation5]  }
  0x17   :  { %183 = dma.done.wait [#allocation3], 16  }
  0x18   :  { %184 = vsyncadd [#allocation3], 4294967280 }
  0x19   :  { %185 = dma.done.wait [#allocation5], 16  }
  0x1a   :  { %186 = vsyncadd [#allocation5], 4294967280 }
  0x1b   :  { %44 = sfence }
  0x1c   :  { %v46_v0 = vld [vmem:[%s245_s1] sm:$0xff]  ;;  %v189_v1 = vmov 0   ;;  %s60_s30 = sld [smem:[#allocation2]]  ;;  %s133_s6 = sld [smem:[#allocation2 + $0x1]] }
  0x1d   :  { %146 = vset.pattern.permute.xlu0 %v189_v1  ;;  %v53_v2 = vld [vmem:[%s246_s2] sm:$0xff]  ;;  %s138_s7 = sld [smem:[#allocation2 + $0x2]]  ;;  %s63_s8 = sld [smem:[#allocation4]] }
  0x1e   :  { %49 = vperm.xlu0 %146, %v46_v0   ;;  %s134_s9 = sld [smem:[#allocation4 + $0x1]]  ;;  %s139_s10 = sld [smem:[#allocation4 + $0x2]]  ;;  %v45_v4 = vld [vmem:[%s244_s0] sm:$0xff] }
  0x22   :  { %56 = vperm.xlu0 %146, %v53_v2   ;;  %v61_v6 = vstv %s60_s30  ;;  %v82_v7 = vstv %s133_s6 }
  0x23   :  { %v104_v8 = vstv %s138_s7  ;;  %v64_v11 = vstv %s63_s8 }
  0x24   :  { %v85_v12 = vstv %s134_s9  ;;  %v107_v13 = vstv %s139_s10 }
  0x9d   :  { %v50_v3 = vpop.permute.xlu0 %49 }
  0x9e   :  { %v52_v5 = vsub.f32 %v45_v4, %v50_v3 }
  0xa1   :  { %v57_v9 = vpop.permute.xlu0 %56 }
  0xa2   :  { %v59_v10 = vmul.f32 %v57_v9, %v52_v5 }
  0xa4   :  { %v62_v14 = vsub.f32 %v59_v10, %v61_v6  ;;  %v83_v15 = vsub.f32 %v59_v10, %v82_v7  ;;  %v105_v16 = vsub.f32 %v59_v10, %v104_v8 }
  0xa6   :  { %v65_v17 = vmul.f32 %v64_v11, %v62_v14  ;;  %v86_v18 = vmul.f32 %v85_v12, %v83_v15  ;;  %v108_v19 = vmul.f32 %v107_v13, %v105_v16 }
  0xa8   :  { %v66_v20 = vmul.f32 0.07056599, %v65_v17  ;;  %v87_v21 = vmul.f32 0.07056599, %v86_v18  ;;  %v109_v22 = vmul.f32 0.07056599, %v108_v19 }
  0xa9   :  { %v69_v27 = vmul.f32 1.5976, %v65_v17  ;;  %v90_v29 = vmul.f32 1.5976, %v86_v18  ;;  %v112_v31 = vmul.f32 1.5976, %v108_v19 }
  0xaa   :  { %v67_v23 = vmul.f32 %v66_v20, %v65_v17  ;;  %v88_v24 = vmul.f32 %v87_v21, %v86_v18  ;;  %v110_v25 = vmul.f32 %v109_v22, %v108_v19 }
  0xac   :  { %v68_v26 = vmul.f32 %v67_v23, %v65_v17  ;;  %v89_v28 = vmul.f32 %v88_v24, %v86_v18  ;;  %v111_v30 = vmul.f32 %v110_v25, %v108_v19 }
  0xae   :  { %v70_v32 = vadd.f32 %v69_v27, %v68_v26  ;;  %v91_v33 = vadd.f32 %v90_v29, %v89_v28  ;;  %v113_v34 = vadd.f32 %v112_v31, %v111_v30 }
  0xb0   :  { %v131_v35 = vclamps-f32 %v70_v32, 60.0  ;;  %v135_v36 = vclamps-f32 %v91_v33, 60.0  ;;  %v140_v37 = vclamps-f32 %v113_v34, 60.0 }
  0xb2   :  { %v73_v38 = vsub.f32 0.0, %v131_v35  ;;  %v94_v39 = vsub.f32 0.0, %v135_v36  ;;  %v116_v40 = vsub.f32 0.0, %v140_v37 }
  0xb4   :  { %v74_v41 = vmul.f32 1.442695, %v73_v38  ;;  %v95_v42 = vmul.f32 1.442695, %v94_v39  ;;  %v117_v43 = vmul.f32 1.442695, %v116_v40 }
  0xb6   :  { %147 = vpow2.f32 %v74_v41 }
  0xb7   :  { %149 = vpow2.f32 %v95_v42 }
  0xb8   :  { %151 = vpow2.f32 %v117_v43 }
  0xc0   :  { %v148_v44 = vpop.eup %147 }
  0xc1   :  { %v150_v45 = vpop.eup %149  ;;  %v76_v46 = vadd.f32 1.0, %v148_v44 }
  0xc2   :  { %v152_v47 = vpop.eup %151  ;;  %v97_v48 = vadd.f32 1.0, %v150_v45 }
  0xc3   :  { %153 = vrcp.f32 %v76_v46  ;;  %v119_v49 = vadd.f32 1.0, %v152_v47 }
  0xc4   :  { %155 = vrcp.f32 %v97_v48 }
  0xc5   :  { %157 = vrcp.f32 %v119_v49 }
  0xcd   :  { %v154_v50 = vpop.eup %153 }
  0xce   :  { %v156_v51 = vpop.eup %155  ;;  %v132_v52 = vclamps-f32 %v154_v50, 10.0 }
  0xcf   :  { %v158_v53 = vpop.eup %157  ;;  %v136_v54 = vclamps-f32 %v156_v51, 10.0 }
  0xd0   :  { %80 = vst [vmem:[%s249_s5] sm:$0xff] %v132_v52  ;;  %v141_v55 = vclamps-f32 %v158_v53, 10.0 }
  0xd1   :  { %137 = vst [vmem:[%s249_s5 + $0x8] sm:$0xff] %v136_v54 }
  0xd2   :  { %142 = vst [vmem:[%s249_s5 + $0x10] sm:$0xff] %v141_v55 }
  0xd3   :  { %129 = vsyncpa [#allocation3], 1 }
  0xd4   :  { %130 = vsyncpa [#allocation5], 1 }

</bundles_post_ra>
